<compile_context>
chip_gen: v6e
topology: v6e:2x2x1
jax: 0.10.0
libtpu: 0.0.40
codegen_flags: <defaults>
</compile_context>

<pallas_src>
import functools

import jax
import jax.numpy as jnp
from jax.experimental import pallas as pl
from jax.experimental.pallas import tpu as pltpu

LANE = 128


# ------------------------------- kernel -------------------------------------

def _bottleneck_kernel(x_ref, w1_ref, b1_ref, w2_ref, b2_ref, w3_ref, b3_ref,
                       *rest, stride, has_proj, spatial):
    if has_proj:
        wsc_ref, bsc_ref, o_ref, t1p_ref = rest
    else:
        o_ref, t1p_ref = rest

    f32, bf16 = jnp.float32, jnp.bfloat16
    H, W = spatial
    Ho, Wo = H // stride, W // stride
    hw = Ho * Wo
    P = w1_ref.shape[1]

    # x rows:
    #   stride == 1: row y*W + x           holds pixel (y, x)
    #   stride == 2: row (2a+b)*hw + i*Wo+j holds pixel (2i+a, 2j+b)  (phase-major)
    x2 = x_ref[0]                                       # (S, Ci) bf16

    # ---- conv1 (1x1) + folded BN1 + ReLU ------------------------------------
    t1 = jnp.dot(x2, w1_ref[:, :], preferred_element_type=f32)
    t1 = jnp.maximum(t1 + b1_ref[:, :], 0.0).astype(bf16)   # (S, P) bf16

    # ---- write t1 into the zero-padded bf16 VMEM scratch ---------------------
    if stride == 1:
        t1p_ref[1:H + 1, 1:W + 1, :] = t1.reshape(H, W, P)
        zr = jnp.zeros((1, W + 2, P), bf16)
        t1p_ref[0:1, :, :] = zr
        t1p_ref[H + 1:H + 2, :, :] = zr
        zc = jnp.zeros((H, 1, P), bf16)
        t1p_ref[1:H + 1, 0:1, :] = zc
        t1p_ref[1:H + 1, W + 1:W + 2, :] = zc

        def tap(ky, kx):
            return t1p_ref[ky:ky + Ho, kx:kx + Wo, :]
    else:
        # Phase-decomposed padded scratch: padded position (r, c) lives at
        # scratch[r % 2, c % 2, r // 2, c // 2, :].  Input phase (a, b)
        # (rows [(2a+b)*hw, (2a+b+1)*hw)) maps to scratch[1-a, 1-b, a:, b:].
        t1p_ref[1, 1, 0:Ho, 0:Wo, :] = t1[0 * hw:1 * hw].reshape(Ho, Wo, P)
        t1p_ref[1, 0, 0:Ho, 1:Wo + 1, :] = t1[1 * hw:2 * hw].reshape(Ho, Wo, P)
        t1p_ref[0, 1, 1:Ho + 1, 0:Wo, :] = t1[2 * hw:3 * hw].reshape(Ho, Wo, P)
        t1p_ref[0, 0, 1:Ho + 1, 1:Wo + 1, :] = t1[3 * hw:4 * hw].reshape(Ho, Wo, P)
        # Only padded row 0 and padded col 0 are ever read from the border.
        t1p_ref[0:1, :, 0:1, :, :] = jnp.zeros((1, 2, 1, Wo + 1, P), bf16)
        t1p_ref[:, 0:1, :, 0:1, :] = jnp.zeros((2, 1, Ho + 1, 1, P), bf16)

        def tap(ky, kx):
            # output (oy, ox) tap (ky, kx) reads padded (2*oy+ky, 2*ox+kx)
            return t1p_ref[ky % 2, kx % 2,
                           ky // 2:ky // 2 + Ho,
                           kx // 2:kx // 2 + Wo, :]

    # ---- conv2 (3x3, pad=1, stride) + folded BN2 + ReLU ----------------------
    # 9 unit-stride taps; bf16 operands, f32 MXU accumulation; accumulator is
    # initialised from the first tap's matmul + bias (no zeros pass).
    acc = jnp.dot(tap(0, 0).reshape(hw, P), w2_ref[0, 0, :, :],
                  preferred_element_type=f32) + b2_ref[:, :]
    for ky in range(3):
        for kx in range(3):
            if ky == 0 and kx == 0:
                continue
            acc = acc + jnp.dot(tap(ky, kx).reshape(hw, P),
                                w2_ref[ky, kx, :, :],
                                preferred_element_type=f32)
    t2 = jnp.maximum(acc, 0.0).astype(bf16)

    # ---- conv3 (1x1) + folded BN3 -------------------------------------------
    t3 = jnp.dot(t2, w3_ref[:, :], preferred_element_type=f32) + b3_ref[:, :]

    # ---- shortcut ------------------------------------------------------------
    if has_proj:
        # stride == 2: phase (0,0) rows == x at even rows/cols (1x1 stride-2 conv)
        xs = x2 if stride == 1 else x2[0:hw, :]
        sc = jnp.dot(xs, wsc_ref[:, :], preferred_element_type=f32) + bsc_ref[:, :]
    else:
        sc = x2.astype(f32)                              # identity (Ci == Co)

    out = jnp.maximum(t3 + sc, 0.0)
    o_ref[0] = out.astype(o_ref.dtype)


# ------------------------------- wrapper -------------------------------------

def _round_up(n, m):
    return (n + m - 1) // m * m


def _fold_bn(bn, eps=1e-5):
    gamma, beta, mean, var = bn
    scale = gamma / jnp.sqrt(var + eps)
    bias = beta - mean * scale
    return scale, bias


def _pad_last(a, target):
    pad = target - a.shape[-1]
    if pad == 0:
        return a
    return jnp.pad(a, [(0, 0)] * (a.ndim - 1) + [(0, pad)])


def _pad2(w, rows, cols):
    return jnp.pad(w, ((0, rows - w.shape[0]), (0, cols - w.shape[1])))


def bottleneck_forward_nhwc(x_nhwc, params, stride, has_proj):
    """Fused Bottleneck on an NHWC activation.  Input is cast to bf16, output
    is bf16 (keep the surrounding network bf16/NHWC to avoid per-block
    dtype/layout HBM passes)."""
    N, H, W, Cin = x_nhwc.shape
    assert H % stride == 0 and W % stride == 0
    P = params['conv1'].shape[0]
    Cout = params['conv3'].shape[0]
    if not has_proj:
        assert stride == 1 and Cin == Cout
    Ho, Wo = H // stride, W // stride
    hw = Ho * Wo

    Cin_p = _round_up(Cin, LANE)
    P_p = _round_up(P, LANE)
    Cout_p = _round_up(Cout, LANE)

    bf16, f32 = jnp.bfloat16, jnp.float32

    # Fold eval-mode BN: scale -> into the conv weights, bias -> kernel add.
    s1, b1 = _fold_bn(params['bn1'])
    s2, b2 = _fold_bn(params['bn2'])
    s3, b3 = _fold_bn(params['bn3'])

    w1 = _pad2(params['conv1'][:, :, 0, 0].T * s1[None, :], Cin_p, P_p).astype(bf16)
    w2 = jnp.transpose(params['conv2'], (2, 3, 1, 0)) * s2[None, None, None, :]
    w2 = jnp.pad(w2, ((0, 0), (0, 0), (0, P_p - P), (0, P_p - P))).astype(bf16)
    w3 = _pad2(params['conv3'][:, :, 0, 0].T * s3[None, :], P_p, Cout_p).astype(bf16)

    b1p = _pad_last(b1.reshape(1, -1), P_p).astype(f32)
    b2p = _pad_last(b2.reshape(1, -1), P_p).astype(f32)
    b3p = _pad_last(b3.reshape(1, -1), Cout_p).astype(f32)

    # bf16 activations in HBM; channel dim padded to a multiple of 128 lanes.
    xp = _pad_last(x_nhwc, Cin_p).astype(bf16)
    if stride == 1:
        xk = xp.reshape(N, H * W, Cin_p)
    else:
        # Phase-major layout (wrapper-side layout plumbing, pure XLA):
        # row (2a+b)*hw + i*Wo + j holds pixel (2i+a, 2j+b).
        xk = (xp.reshape(N, Ho, 2, Wo, 2, Cin_p)
                .transpose(0, 2, 4, 1, 3, 5)
                .reshape(N, 4 * hw, Cin_p))
    S = xk.shape[1]

    ops = [xk, w1, b1p, w2, b2p, w3, b3p]
    if has_proj:
        ssc, bsc = _fold_bn(params['bn_sc'])
        wsc = _pad2(params['conv_sc'][:, :, 0, 0].T * ssc[None, :],
                    Cin_p, Cout_p).astype(bf16)
        bscp = _pad_last(bsc.reshape(1, -1), Cout_p).astype(f32)
        ops += [wsc, bscp]

    def full_spec(a):
        nd = a.ndim
        return pl.BlockSpec(a.shape, lambda n, _nd=nd: (0,) * _nd)

    in_specs = [pl.BlockSpec((1, S, Cin_p), lambda n: (n, 0, 0))]
    in_specs += [full_spec(a) for a in ops[1:]]
    out_spec = pl.BlockSpec((1, hw, Cout_p), lambda n: (n, 0, 0))

    if stride == 1:
        scratch = pltpu.VMEM((H + 2, W + 2, P_p), bf16)
        scratch_bytes = (H + 2) * (W + 2) * P_p * 2
    else:
        scratch = pltpu.VMEM((2, 2, Ho + 1, Wo + 1, P_p), bf16)
        scratch_bytes = 4 * (Ho + 1) * (Wo + 1) * P_p * 2

    # Explicit VMEM budget: double-buffered activation blocks + weights +
    # scratch + in-kernel temporaries, plus headroom.
    wbytes = sum(int(a.size) * a.dtype.itemsize for a in ops[1:])
    in_block = S * Cin_p * 2
    out_block = hw * Cout_p * 2
    temps = S * P_p * 4 + hw * P_p * 4 + 3 * hw * Cout_p * 4 + S * Cin_p * 2
    vmem_need = 2 * (in_block + out_block) + 2 * wbytes + scratch_bytes + temps
    vmem_limit = int(min(vmem_need + (8 << 20), 96 * 1024 * 1024))

    # Advisory cost estimate so XLA schedules the custom call sensibly.
    flops = (2 * H * W * Cin_p * P_p
             + 2 * hw * 9 * P_p * P_p
             + 2 * hw * P_p * Cout_p)
    if has_proj:
        flops += 2 * hw * Cin_p * Cout_p
    flops *= N
    bytes_accessed = int(xk.size) * 2 + int(N * hw * Cout_p) * 2 + int(wbytes)

    kernel = functools.partial(_bottleneck_kernel, stride=stride,
                               has_proj=has_proj, spatial=(H, W))
    out = pl.pallas_call(
        kernel,
        out_shape=jax.ShapeDtypeStruct((N, hw, Cout_p), bf16),
        grid=(N,),
        in_specs=in_specs,
        out_specs=out_spec,
        scratch_shapes=[scratch],
        compiler_params=pltpu.CompilerParams(
            dimension_semantics=("parallel",),
            vmem_limit_bytes=vmem_limit),
        cost_estimate=pl.CostEstimate(flops=int(flops), transcendentals=0,
                                      bytes_accessed=int(bytes_accessed)),
    )(*ops)

    out = out.reshape(N, Ho, Wo, Cout_p)
    if Cout_p != Cout:
        out = out[..., :Cout]
    return out


def bottleneck_forward(x_nchw, params, stride, has_proj):
    """NCHW / f32 wrapper matching the PyTorch module (transposes and the
    f32<->bf16 casts are hoistable by keeping the network NHWC/bf16 and calling
    bottleneck_forward_nhwc directly)."""
    x_nhwc = jnp.transpose(x_nchw, (0, 2, 3, 1))
    out_nhwc = bottleneck_forward_nhwc(x_nhwc, params, stride, has_proj)
    return jnp.transpose(out_nhwc, (0, 3, 1, 2)).astype(x_nchw.dtype)


# --------------------------- parameter init ----------------------------------

def init_params(key, in_planes, planes, stride):
    expansion = 4
    ks = jax.random.split(key, 8)

    def conv_w(k, o, i, kh, kw):
        return (jax.random.normal(k, (o, i, kh, kw), jnp.float32)
                / jnp.sqrt(float(i * kh * kw)))

    def bn_p(k, c):
        k1, k2, k3, k4 = jax.random.split(k, 4)
        gamma = 1.0 + 0.1 * jax.random.normal(k1, (c,), jnp.float32)
        beta = 0.1 * jax.random.normal(k2, (c,), jnp.float32)
        mean = 0.1 * jax.random.normal(k3, (c,), jnp.float32)
        var = 1.0 + 0.1 * jnp.abs(jax.random.normal(k4, (c,), jnp.float32))
        return gamma, beta, mean, var

    p = {
        'conv1': conv_w(ks[0], planes, in_planes, 1, 1),
        'bn1': bn_p(ks[1], planes),
        'conv2': conv_w(ks[2], planes, planes, 3, 3),
        'bn2': bn_p(ks[3], planes),
        'conv3': conv_w(ks[4], expansion * planes, planes, 1, 1),
        'bn3': bn_p(ks[5], expansion * planes),
    }
    has_proj = (stride != 1) or (in_planes != expansion * planes)
    if has_proj:
        p['conv_sc'] = conv_w(ks[6], expansion * planes, in_planes, 1, 1)
        p['bn_sc'] = bn_p(ks[7], expansion * planes)
    return p, has_proj


# --------------------------- pure-JAX reference -------------------------------

def bottleneck_ref(x, params, stride, has_proj, eps=1e-5):
    def conv(x, w, s, pad):
        return jax.lax.conv_general_dilated(
            x, w, (s, s), pad, dimension_numbers=('NCHW', 'OIHW', 'NCHW'))

    def bn(x, p):
        gamma, beta, mean, var = p
        return ((x - mean[None, :, None, None])
                / jnp.sqrt(var[None, :, None, None] + eps)
                * gamma[None, :, None, None] + beta[None, :, None, None])

    out = jax.nn.relu(bn(conv(x, params['conv1'], 1, 'VALID'), params['bn1']))
    out = jax.nn.relu(bn(conv(out, params['conv2'], stride, [(1, 1), (1, 1)]),
                         params['bn2']))
    out = bn(conv(out, params['conv3'], 1, 'VALID'), params['bn3'])
    if has_proj:
        sc = bn(conv(x, params['conv_sc'], stride, 'VALID'), params['bn_sc'])
    else:
        sc = x
    return jax.nn.relu(out + sc)


if __name__ == "__main__":
    key = jax.random.PRNGKey(0)
    N = 2
    configs = [
        # (in_planes, planes, stride, H, W)
        (16, 8, 2, 16, 16),   # projection shortcut (stride 2, channel change)
        (32, 8, 1, 16, 16),   # identity shortcut (in_planes == 4*planes)
        (64, 32, 1, 16, 16),  # projection shortcut, stride 1
    ]
    for idx, (cin, planes, stride, H, W) in enumerate(configs):
        kx_, kp = jax.random.split(jax.random.fold_in(key, idx))
        x = jax.random.normal(kx_, (N, cin, H, W), jnp.float32)
        params, has_proj = init_params(kp, cin, planes, stride)

        out = jax.block_until_ready(
            bottleneck_forward(x, params, stride, has_proj))
        ref = bottleneck_ref(x, params, stride, has_proj)
        assert out.shape == ref.shape, (out.shape, ref.shape)
        err = float(jnp.max(jnp.abs(out - ref)))
        scale = float(jnp.max(jnp.abs(ref))) + 1e-6
        # bf16 activations/weights with f32 accumulation -> relative tolerance.
        assert err <= 4e-2 * scale + 1e-2, (
            f"config {idx}: max abs err {err} vs ref scale {scale}")
    print("KERNEL_OK")
</pallas_src>

<mosaic_0001>
module attributes {stable_mosaic.version = 11 : i64} {
  func.func @_bottleneck_kernel(%arg0: i32, %arg1: memref<1x256x128xbf16, #tpu.memory_space<vmem>>, %arg2: memref<128x128xbf16, #tpu.memory_space<vmem>>, %arg3: memref<1x128xf32, #tpu.memory_space<vmem>>, %arg4: memref<3x3x128x128xbf16, #tpu.memory_space<vmem>>, %arg5: memref<1x128xf32, #tpu.memory_space<vmem>>, %arg6: memref<128x128xbf16, #tpu.memory_space<vmem>>, %arg7: memref<1x128xf32, #tpu.memory_space<vmem>>, %arg8: memref<128x128xbf16, #tpu.memory_space<vmem>>, %arg9: memref<1x128xf32, #tpu.memory_space<vmem>>, %arg10: memref<1x64x128xbf16, #tpu.memory_space<vmem>>, %arg11: memref<2x2x9x9x128xbf16, #tpu.memory_space<vmem>>) attributes {dimension_semantics = [#tpu.dimension_semantics<parallel>], iteration_bounds = array<i64: 2>, scalar_prefetch = 0 : i64, scratch_operands = 1 : i64, tpu.core_type = #tpu.core_type<tc>, window_params = [{transform_indices = @transform_0, window_bounds = array<i64: 1, 256, 128>}, {pipeline_mode = #tpu.pipeline_mode<synchronous>, transform_indices = @transform_1, window_bounds = array<i64: 128, 128>}, {pipeline_mode = #tpu.pipeline_mode<synchronous>, transform_indices = @transform_2, window_bounds = array<i64: 1, 128>}, {pipeline_mode = #tpu.pipeline_mode<synchronous>, transform_indices = @transform_3, window_bounds = array<i64: 3, 3, 128, 128>}, {pipeline_mode = #tpu.pipeline_mode<synchronous>, transform_indices = @transform_4, window_bounds = array<i64: 1, 128>}, {pipeline_mode = #tpu.pipeline_mode<synchronous>, transform_indices = @transform_5, window_bounds = array<i64: 128, 128>}, {pipeline_mode = #tpu.pipeline_mode<synchronous>, transform_indices = @transform_6, window_bounds = array<i64: 1, 128>}, {pipeline_mode = #tpu.pipeline_mode<synchronous>, transform_indices = @transform_7, window_bounds = array<i64: 128, 128>}, {pipeline_mode = #tpu.pipeline_mode<synchronous>, transform_indices = @transform_8, window_bounds = array<i64: 1, 128>}, {transform_indices = @transform_9, window_bounds = array<i64: 1, 64, 128>}]} {
    %c0 = arith.constant 0 : index
    %c0_0 = arith.constant 0 : index
    %c0_1 = arith.constant 0 : index
    %0 = vector.load %arg1[%c0, %c0_0, %c0_1] : memref<1x256x128xbf16, #tpu.memory_space<vmem>>, vector<1x256x128xbf16>
    %1 = vector.shape_cast %0 : vector<1x256x128xbf16> to vector<256x128xbf16>
    %c0_2 = arith.constant 0 : index
    %c0_3 = arith.constant 0 : index
    %2 = vector.load %arg2[%c0_2, %c0_3] : memref<128x128xbf16, #tpu.memory_space<vmem>>, vector<128x128xbf16>
    %cst = arith.constant dense<0.000000e+00> : vector<256x128xf32>
    %3 = tpu.matmul %1, %2, %cst {dimension_numbers = #tpu.dot_dimension_numbers<[1], [0], [0], [1], [0, 0, 1, 1], [], []>} : vector<256x128xbf16>, vector<128x128xbf16>, vector<256x128xf32> -> vector<256x128xf32>
    %c0_4 = arith.constant 0 : index
    %c0_5 = arith.constant 0 : index
    %4 = vector.load %arg3[%c0_4, %c0_5] : memref<1x128xf32, #tpu.memory_space<vmem>>, vector<1x128xf32>
    %5 = vector.broadcast %4 : vector<1x128xf32> to vector<256x128xf32>
    %6 = arith.addf %3, %5 : vector<256x128xf32>
    %cst_6 = arith.constant 0.000000e+00 : f32
    %7 = vector.broadcast %cst_6 : f32 to vector<256x128xf32>
    %8 = arith.maximumf %6, %7 : vector<256x128xf32>
    %9 = arith.truncf %8 : vector<256x128xf32> to vector<256x128xbf16>
    %10 = vector.extract_strided_slice %9 {offsets = [0, 0], sizes = [64, 128], strides = [1, 1]} : vector<256x128xbf16> to vector<64x128xbf16>
    %11 = vector.shape_cast %10 : vector<64x128xbf16> to vector<8x8x128xbf16>
    %c1 = arith.constant 1 : index
    %c1_7 = arith.constant 1 : index
    %c0_8 = arith.constant 0 : index
    %c0_9 = arith.constant 0 : index
    %c0_10 = arith.constant 0 : index
    %12 = vector.load %arg11[%c1, %c1_7, %c0_8, %c0_9, %c0_10] : memref<2x2x9x9x128xbf16, #tpu.memory_space<vmem>>, vector<1x1x8x8x128xbf16>
    %13 = vector.shape_cast %12 : vector<1x1x8x8x128xbf16> to vector<8x8x128xbf16>
    %14 = vector.shape_cast %11 : vector<8x8x128xbf16> to vector<1x1x8x8x128xbf16>
    tpu.vector_store %arg11[%c1, %c1_7, %c0_8, %c0_9, %c0_10], %14 {strides = array<i32>} : memref<2x2x9x9x128xbf16, #tpu.memory_space<vmem>>, vector<1x1x8x8x128xbf16>,
    %15 = vector.extract_strided_slice %9 {offsets = [64, 0], sizes = [64, 128], strides = [1, 1]} : vector<256x128xbf16> to vector<64x128xbf16>
    %16 = vector.shape_cast %15 : vector<64x128xbf16> to vector<8x8x128xbf16>
    %c1_11 = arith.constant 1 : index
    %c0_12 = arith.constant 0 : index
    %c0_13 = arith.constant 0 : index
    %c1_14 = arith.constant 1 : index
    %c0_15 = arith.constant 0 : index
    %17 = vector.load %arg11[%c1_11, %c0_12, %c0_13, %c1_14, %c0_15] : memref<2x2x9x9x128xbf16, #tpu.memory_space<vmem>>, vector<1x1x8x8x128xbf16>
    %18 = vector.shape_cast %17 : vector<1x1x8x8x128xbf16> to vector<8x8x128xbf16>
    %19 = vector.shape_cast %16 : vector<8x8x128xbf16> to vector<1x1x8x8x128xbf16>
    tpu.vector_store %arg11[%c1_11, %c0_12, %c0_13, %c1_14, %c0_15], %19 {strides = array<i32>} : memref<2x2x9x9x128xbf16, #tpu.memory_space<vmem>>, vector<1x1x8x8x128xbf16>,
    %20 = vector.extract_strided_slice %9 {offsets = [128, 0], sizes = [64, 128], strides = [1, 1]} : vector<256x128xbf16> to vector<64x128xbf16>
    %21 = vector.shape_cast %20 : vector<64x128xbf16> to vector<8x8x128xbf16>
    %c0_16 = arith.constant 0 : index
    %c1_17 = arith.constant 1 : index
    %c1_18 = arith.constant 1 : index
    %c0_19 = arith.constant 0 : index
    %c0_20 = arith.constant 0 : index
    %22 = vector.load %arg11[%c0_16, %c1_17, %c1_18, %c0_19, %c0_20] : memref<2x2x9x9x128xbf16, #tpu.memory_space<vmem>>, vector<1x1x8x8x128xbf16>
    %23 = vector.shape_cast %22 : vector<1x1x8x8x128xbf16> to vector<8x8x128xbf16>
    %24 = vector.shape_cast %21 : vector<8x8x128xbf16> to vector<1x1x8x8x128xbf16>
    tpu.vector_store %arg11[%c0_16, %c1_17, %c1_18, %c0_19, %c0_20], %24 {strides = array<i32>} : memref<2x2x9x9x128xbf16, #tpu.memory_space<vmem>>, vector<1x1x8x8x128xbf16>,
    %25 = vector.extract_strided_slice %9 {offsets = [192, 0], sizes = [64, 128], strides = [1, 1]} : vector<256x128xbf16> to vector<64x128xbf16>
    %26 = vector.shape_cast %25 : vector<64x128xbf16> to vector<8x8x128xbf16>
    %c0_21 = arith.constant 0 : index
    %c0_22 = arith.constant 0 : index
    %c1_23 = arith.constant 1 : index
    %c1_24 = arith.constant 1 : index
    %c0_25 = arith.constant 0 : index
    %27 = vector.load %arg11[%c0_21, %c0_22, %c1_23, %c1_24, %c0_25] : memref<2x2x9x9x128xbf16, #tpu.memory_space<vmem>>, vector<1x1x8x8x128xbf16>
    %28 = vector.shape_cast %27 : vector<1x1x8x8x128xbf16> to vector<8x8x128xbf16>
    %29 = vector.shape_cast %26 : vector<8x8x128xbf16> to vector<1x1x8x8x128xbf16>
    tpu.vector_store %arg11[%c0_21, %c0_22, %c1_23, %c1_24, %c0_25], %29 {strides = array<i32>} : memref<2x2x9x9x128xbf16, #tpu.memory_space<vmem>>, vector<1x1x8x8x128xbf16>,
    %cst_26 = arith.constant 0.000000e+00 : bf16
    %30 = vector.broadcast %cst_26 : bf16 to vector<1x2x1x9x128xbf16>
    %c0_27 = arith.constant 0 : index
    %c0_28 = arith.constant 0 : index
    %c0_29 = arith.constant 0 : index
    %c0_30 = arith.constant 0 : index
    %c0_31 = arith.constant 0 : index
    %31 = vector.load %arg11[%c0_27, %c0_28, %c0_29, %c0_30, %c0_31] : memref<2x2x9x9x128xbf16, #tpu.memory_space<vmem>>, vector<1x2x1x9x128xbf16>
    tpu.vector_store %arg11[%c0_27, %c0_28, %c0_29, %c0_30, %c0_31], %30 {strides = array<i32>} : memref<2x2x9x9x128xbf16, #tpu.memory_space<vmem>>, vector<1x2x1x9x128xbf16>,
    %cst_32 = arith.constant 0.000000e+00 : bf16
    %32 = vector.broadcast %cst_32 : bf16 to vector<2x1x9x1x128xbf16>
    %c0_33 = arith.constant 0 : index
    %c0_34 = arith.constant 0 : index
    %c0_35 = arith.constant 0 : index
    %c0_36 = arith.constant 0 : index
    %c0_37 = arith.constant 0 : index
    %33 = vector.load %arg11[%c0_33, %c0_34, %c0_35, %c0_36, %c0_37] : memref<2x2x9x9x128xbf16, #tpu.memory_space<vmem>>, vector<2x1x9x1x128xbf16>
    tpu.vector_store %arg11[%c0_33, %c0_34, %c0_35, %c0_36, %c0_37], %32 {strides = array<i32>} : memref<2x2x9x9x128xbf16, #tpu.memory_space<vmem>>, vector<2x1x9x1x128xbf16>,
    %c0_38 = arith.constant 0 : index
    %c0_39 = arith.constant 0 : index
    %c0_40 = arith.constant 0 : index
    %c0_41 = arith.constant 0 : index
    %c0_42 = arith.constant 0 : index
    %34 = vector.load %arg11[%c0_38, %c0_39, %c0_40, %c0_41, %c0_42] : memref<2x2x9x9x128xbf16, #tpu.memory_space<vmem>>, vector<1x1x8x8x128xbf16>
    %35 = vector.shape_cast %34 : vector<1x1x8x8x128xbf16> to vector<8x8x128xbf16>
    %36 = vector.shape_cast %35 : vector<8x8x128xbf16> to vector<64x128xbf16>
    %c0_43 = arith.constant 0 : index
    %c0_44 = arith.constant 0 : index
    %c0_45 = arith.constant 0 : index
    %c0_46 = arith.constant 0 : index
    %37 = vector.load %arg4[%c0_43, %c0_44, %c0_45, %c0_46] : memref<3x3x128x128xbf16, #tpu.memory_space<vmem>>, vector<1x1x128x128xbf16>
    %38 = vector.shape_cast %37 : vector<1x1x128x128xbf16> to vector<128x128xbf16>
    %cst_47 = arith.constant dense<0.000000e+00> : vector<64x128xf32>
    %39 = tpu.matmul %36, %38, %cst_47 {dimension_numbers = #tpu.dot_dimension_numbers<[1], [0], [0], [1], [0, 0, 1, 1], [], []>} : vector<64x128xbf16>, vector<128x128xbf16>, vector<64x128xf32> -> vector<64x128xf32>
    %c0_48 = arith.constant 0 : index
    %c0_49 = arith.constant 0 : index
    %40 = vector.load %arg5[%c0_48, %c0_49] : memref<1x128xf32, #tpu.memory_space<vmem>>, vector<1x128xf32>
    %41 = vector.broadcast %40 : vector<1x128xf32> to vector<64x128xf32>
    %42 = arith.addf %39, %41 : vector<64x128xf32>
    %c0_50 = arith.constant 0 : index
    %c1_51 = arith.constant 1 : index
    %c0_52 = arith.constant 0 : index
    %c0_53 = arith.constant 0 : index
    %c0_54 = arith.constant 0 : index
    %43 = vector.load %arg11[%c0_50, %c1_51, %c0_52, %c0_53, %c0_54] : memref<2x2x9x9x128xbf16, #tpu.memory_space<vmem>>, vector<1x1x8x8x128xbf16>
    %44 = vector.shape_cast %43 : vector<1x1x8x8x128xbf16> to vector<8x8x128xbf16>
    %45 = vector.shape_cast %44 : vector<8x8x128xbf16> to vector<64x128xbf16>
    %c0_55 = arith.constant 0 : index
    %c1_56 = arith.constant 1 : index
    %c0_57 = arith.constant 0 : index
    %c0_58 = arith.constant 0 : index
    %46 = vector.load %arg4[%c0_55, %c1_56, %c0_57, %c0_58] : memref<3x3x128x128xbf16, #tpu.memory_space<vmem>>, vector<1x1x128x128xbf16>
    %47 = vector.shape_cast %46 : vector<1x1x128x128xbf16> to vector<128x128xbf16>
    %cst_59 = arith.constant dense<0.000000e+00> : vector<64x128xf32>
    %48 = tpu.matmul %45, %47, %cst_59 {dimension_numbers = #tpu.dot_dimension_numbers<[1], [0], [0], [1], [0, 0, 1, 1], [], []>} : vector<64x128xbf16>, vector<128x128xbf16>, vector<64x128xf32> -> vector<64x128xf32>
    %49 = arith.addf %42, %48 : vector<64x128xf32>
    %c0_60 = arith.constant 0 : index
    %c0_61 = arith.constant 0 : index
    %c0_62 = arith.constant 0 : index
    %c1_63 = arith.constant 1 : index
    %c0_64 = arith.constant 0 : index
    %50 = vector.load %arg11[%c0_60, %c0_61, %c0_62, %c1_63, %c0_64] : memref<2x2x9x9x128xbf16, #tpu.memory_space<vmem>>, vector<1x1x8x8x128xbf16>
    %51 = vector.shape_cast %50 : vector<1x1x8x8x128xbf16> to vector<8x8x128xbf16>
    %52 = vector.shape_cast %51 : vector<8x8x128xbf16> to vector<64x128xbf16>
    %c0_65 = arith.constant 0 : index
    %c2 = arith.constant 2 : index
    %c0_66 = arith.constant 0 : index
    %c0_67 = arith.constant 0 : index
    %53 = vector.load %arg4[%c0_65, %c2, %c0_66, %c0_67] : memref<3x3x128x128xbf16, #tpu.memory_space<vmem>>, vector<1x1x128x128xbf16>
    %54 = vector.shape_cast %53 : vector<1x1x128x128xbf16> to vector<128x128xbf16>
    %cst_68 = arith.constant dense<0.000000e+00> : vector<64x128xf32>
    %55 = tpu.matmul %52, %54, %cst_68 {dimension_numbers = #tpu.dot_dimension_numbers<[1], [0], [0], [1], [0, 0, 1, 1], [], []>} : vector<64x128xbf16>, vector<128x128xbf16>, vector<64x128xf32> -> vector<64x128xf32>
    %56 = arith.addf %49, %55 : vector<64x128xf32>
    %c1_69 = arith.constant 1 : index
    %c0_70 = arith.constant 0 : index
    %c0_71 = arith.constant 0 : index
    %c0_72 = arith.constant 0 : index
    %c0_73 = arith.constant 0 : index
    %57 = vector.load %arg11[%c1_69, %c0_70, %c0_71, %c0_72, %c0_73] : memref<2x2x9x9x128xbf16, #tpu.memory_space<vmem>>, vector<1x1x8x8x128xbf16>
    %58 = vector.shape_cast %57 : vector<1x1x8x8x128xbf16> to vector<8x8x128xbf16>
    %59 = vector.shape_cast %58 : vector<8x8x128xbf16> to vector<64x128xbf16>
    %c1_74 = arith.constant 1 : index
    %c0_75 = arith.constant 0 : index
    %c0_76 = arith.constant 0 : index
    %c0_77 = arith.constant 0 : index
    %60 = vector.load %arg4[%c1_74, %c0_75, %c0_76, %c0_77] : memref<3x3x128x128xbf16, #tpu.memory_space<vmem>>, vector<1x1x128x128xbf16>
    %61 = vector.shape_cast %60 : vector<1x1x128x128xbf16> to vector<128x128xbf16>
    %cst_78 = arith.constant dense<0.000000e+00> : vector<64x128xf32>
    %62 = tpu.matmul %59, %61, %cst_78 {dimension_numbers = #tpu.dot_dimension_numbers<[1], [0], [0], [1], [0, 0, 1, 1], [], []>} : vector<64x128xbf16>, vector<128x128xbf16>, vector<64x128xf32> -> vector<64x128xf32>
    %63 = arith.addf %56, %62 : vector<64x128xf32>
    %c1_79 = arith.constant 1 : index
    %c1_80 = arith.constant 1 : index
    %c0_81 = arith.constant 0 : index
    %c0_82 = arith.constant 0 : index
    %c0_83 = arith.constant 0 : index
    %64 = vector.load %arg11[%c1_79, %c1_80, %c0_81, %c0_82, %c0_83] : memref<2x2x9x9x128xbf16, #tpu.memory_space<vmem>>, vector<1x1x8x8x128xbf16>
    %65 = vector.shape_cast %64 : vector<1x1x8x8x128xbf16> to vector<8x8x128xbf16>
    %66 = vector.shape_cast %65 : vector<8x8x128xbf16> to vector<64x128xbf16>
    %c1_84 = arith.constant 1 : index
    %c1_85 = arith.constant 1 : index
    %c0_86 = arith.constant 0 : index
    %c0_87 = arith.constant 0 : index
    %67 = vector.load %arg4[%c1_84, %c1_85, %c0_86, %c0_87] : memref<3x3x128x128xbf16, #tpu.memory_space<vmem>>, vector<1x1x128x128xbf16>
    %68 = vector.shape_cast %67 : vector<1x1x128x128xbf16> to vector<128x128xbf16>
    %cst_88 = arith.constant dense<0.000000e+00> : vector<64x128xf32>
    %69 = tpu.matmul %66, %68, %cst_88 {dimension_numbers = #tpu.dot_dimension_numbers<[1], [0], [0], [1], [0, 0, 1, 1], [], []>} : vector<64x128xbf16>, vector<128x128xbf16>, vector<64x128xf32> -> vector<64x128xf32>
    %70 = arith.addf %63, %69 : vector<64x128xf32>
    %c1_89 = arith.constant 1 : index
    %c0_90 = arith.constant 0 : index
    %c0_91 = arith.constant 0 : index
    %c1_92 = arith.constant 1 : index
    %c0_93 = arith.constant 0 : index
    %71 = vector.load %arg11[%c1_89, %c0_90, %c0_91, %c1_92, %c0_93] : memref<2x2x9x9x128xbf16, #tpu.memory_space<vmem>>, vector<1x1x8x8x128xbf16>
    %72 = vector.shape_cast %71 : vector<1x1x8x8x128xbf16> to vector<8x8x128xbf16>
    %73 = vector.shape_cast %72 : vector<8x8x128xbf16> to vector<64x128xbf16>
    %c1_94 = arith.constant 1 : index
    %c2_95 = arith.constant 2 : index
    %c0_96 = arith.constant 0 : index
    %c0_97 = arith.constant 0 : index
    %74 = vector.load %arg4[%c1_94, %c2_95, %c0_96, %c0_97] : memref<3x3x128x128xbf16, #tpu.memory_space<vmem>>, vector<1x1x128x128xbf16>
    %75 = vector.shape_cast %74 : vector<1x1x128x128xbf16> to vector<128x128xbf16>
    %cst_98 = arith.constant dense<0.000000e+00> : vector<64x128xf32>
    %76 = tpu.matmul %73, %75, %cst_98 {dimension_numbers = #tpu.dot_dimension_numbers<[1], [0], [0], [1], [0, 0, 1, 1], [], []>} : vector<64x128xbf16>, vector<128x128xbf16>, vector<64x128xf32> -> vector<64x128xf32>
    %77 = arith.addf %70, %76 : vector<64x128xf32>
    %c0_99 = arith.constant 0 : index
    %c0_100 = arith.constant 0 : index
    %c1_101 = arith.constant 1 : index
    %c0_102 = arith.constant 0 : index
    %c0_103 = arith.constant 0 : index
    %78 = vector.load %arg11[%c0_99, %c0_100, %c1_101, %c0_102, %c0_103] : memref<2x2x9x9x128xbf16, #tpu.memory_space<vmem>>, vector<1x1x8x8x128xbf16>
    %79 = vector.shape_cast %78 : vector<1x1x8x8x128xbf16> to vector<8x8x128xbf16>
    %80 = vector.shape_cast %79 : vector<8x8x128xbf16> to vector<64x128xbf16>
    %c2_104 = arith.constant 2 : index
    %c0_105 = arith.constant 0 : index
    %c0_106 = arith.constant 0 : index
    %c0_107 = arith.constant 0 : index
    %81 = vector.load %arg4[%c2_104, %c0_105, %c0_106, %c0_107] : memref<3x3x128x128xbf16, #tpu.memory_space<vmem>>, vector<1x1x128x128xbf16>
    %82 = vector.shape_cast %81 : vector<1x1x128x128xbf16> to vector<128x128xbf16>
    %cst_108 = arith.constant dense<0.000000e+00> : vector<64x128xf32>
    %83 = tpu.matmul %80, %82, %cst_108 {dimension_numbers = #tpu.dot_dimension_numbers<[1], [0], [0], [1], [0, 0, 1, 1], [], []>} : vector<64x128xbf16>, vector<128x128xbf16>, vector<64x128xf32> -> vector<64x128xf32>
    %84 = arith.addf %77, %83 : vector<64x128xf32>
    %c0_109 = arith.constant 0 : index
    %c1_110 = arith.constant 1 : index
    %c1_111 = arith.constant 1 : index
    %c0_112 = arith.constant 0 : index
    %c0_113 = arith.constant 0 : index
    %85 = vector.load %arg11[%c0_109, %c1_110, %c1_111, %c0_112, %c0_113] : memref<2x2x9x9x128xbf16, #tpu.memory_space<vmem>>, vector<1x1x8x8x128xbf16>
    %86 = vector.shape_cast %85 : vector<1x1x8x8x128xbf16> to vector<8x8x128xbf16>
    %87 = vector.shape_cast %86 : vector<8x8x128xbf16> to vector<64x128xbf16>
    %c2_114 = arith.constant 2 : index
    %c1_115 = arith.constant 1 : index
    %c0_116 = arith.constant 0 : index
    %c0_117 = arith.constant 0 : index
    %88 = vector.load %arg4[%c2_114, %c1_115, %c0_116, %c0_117] : memref<3x3x128x128xbf16, #tpu.memory_space<vmem>>, vector<1x1x128x128xbf16>
    %89 = vector.shape_cast %88 : vector<1x1x128x128xbf16> to vector<128x128xbf16>
    %cst_118 = arith.constant dense<0.000000e+00> : vector<64x128xf32>
    %90 = tpu.matmul %87, %89, %cst_118 {dimension_numbers = #tpu.dot_dimension_numbers<[1], [0], [0], [1], [0, 0, 1, 1], [], []>} : vector<64x128xbf16>, vector<128x128xbf16>, vector<64x128xf32> -> vector<64x128xf32>
    %91 = arith.addf %84, %90 : vector<64x128xf32>
    %c0_119 = arith.constant 0 : index
    %c0_120 = arith.constant 0 : index
    %c1_121 = arith.constant 1 : index
    %c1_122 = arith.constant 1 : index
    %c0_123 = arith.constant 0 : index
    %92 = vector.load %arg11[%c0_119, %c0_120, %c1_121, %c1_122, %c0_123] : memref<2x2x9x9x128xbf16, #tpu.memory_space<vmem>>, vector<1x1x8x8x128xbf16>
    %93 = vector.shape_cast %92 : vector<1x1x8x8x128xbf16> to vector<8x8x128xbf16>
    %94 = vector.shape_cast %93 : vector<8x8x128xbf16> to vector<64x128xbf16>
    %c2_124 = arith.constant 2 : index
    %c2_125 = arith.constant 2 : index
    %c0_126 = arith.constant 0 : index
    %c0_127 = arith.constant 0 : index
    %95 = vector.load %arg4[%c2_124, %c2_125, %c0_126, %c0_127] : memref<3x3x128x128xbf16, #tpu.memory_space<vmem>>, vector<1x1x128x128xbf16>
    %96 = vector.shape_cast %95 : vector<1x1x128x128xbf16> to vector<128x128xbf16>
    %cst_128 = arith.constant dense<0.000000e+00> : vector<64x128xf32>
    %97 = tpu.matmul %94, %96, %cst_128 {dimension_numbers = #tpu.dot_dimension_numbers<[1], [0], [0], [1], [0, 0, 1, 1], [], []>} : vector<64x128xbf16>, vector<128x128xbf16>, vector<64x128xf32> -> vector<64x128xf32>
    %98 = arith.addf %91, %97 : vector<64x128xf32>
    %cst_129 = arith.constant 0.000000e+00 : f32
    %99 = vector.broadcast %cst_129 : f32 to vector<64x128xf32>
    %100 = arith.maximumf %98, %99 : vector<64x128xf32>
    %101 = arith.truncf %100 : vector<64x128xf32> to vector<64x128xbf16>
    %c0_130 = arith.constant 0 : index
    %c0_131 = arith.constant 0 : index
    %102 = vector.load %arg6[%c0_130, %c0_131] : memref<128x128xbf16, #tpu.memory_space<vmem>>, vector<128x128xbf16>
    %cst_132 = arith.constant dense<0.000000e+00> : vector<64x128xf32>
    %103 = tpu.matmul %101, %102, %cst_132 {dimension_numbers = #tpu.dot_dimension_numbers<[1], [0], [0], [1], [0, 0, 1, 1], [], []>} : vector<64x128xbf16>, vector<128x128xbf16>, vector<64x128xf32> -> vector<64x128xf32>
    %c0_133 = arith.constant 0 : index
    %c0_134 = arith.constant 0 : index
    %104 = vector.load %arg7[%c0_133, %c0_134] : memref<1x128xf32, #tpu.memory_space<vmem>>, vector<1x128xf32>
    %105 = vector.broadcast %104 : vector<1x128xf32> to vector<64x128xf32>
    %106 = arith.addf %103, %105 : vector<64x128xf32>
    %107 = vector.extract_strided_slice %1 {offsets = [0, 0], sizes = [64, 128], strides = [1, 1]} : vector<256x128xbf16> to vector<64x128xbf16>
    %c0_135 = arith.constant 0 : index
    %c0_136 = arith.constant 0 : index
    %108 = vector.load %arg8[%c0_135, %c0_136] : memref<128x128xbf16, #tpu.memory_space<vmem>>, vector<128x128xbf16>
    %cst_137 = arith.constant dense<0.000000e+00> : vector<64x128xf32>
    %109 = tpu.matmul %107, %108, %cst_137 {dimension_numbers = #tpu.dot_dimension_numbers<[1], [0], [0], [1], [0, 0, 1, 1], [], []>} : vector<64x128xbf16>, vector<128x128xbf16>, vector<64x128xf32> -> vector<64x128xf32>
    %c0_138 = arith.constant 0 : index
    %c0_139 = arith.constant 0 : index
    %110 = vector.load %arg9[%c0_138, %c0_139] : memref<1x128xf32, #tpu.memory_space<vmem>>, vector<1x128xf32>
    %111 = vector.broadcast %110 : vector<1x128xf32> to vector<64x128xf32>
    %112 = arith.addf %109, %111 : vector<64x128xf32>
    %113 = arith.addf %106, %112 : vector<64x128xf32>
    %cst_140 = arith.constant 0.000000e+00 : f32
    %114 = vector.broadcast %cst_140 : f32 to vector<64x128xf32>
    %115 = arith.maximumf %113, %114 : vector<64x128xf32>
    %116 = arith.truncf %115 : vector<64x128xf32> to vector<64x128xbf16>
    %c0_141 = arith.constant 0 : index
    %c0_142 = arith.constant 0 : index
    %c0_143 = arith.constant 0 : index
    %117 = vector.load %arg10[%c0_141, %c0_142, %c0_143] : memref<1x64x128xbf16, #tpu.memory_space<vmem>>, vector<1x64x128xbf16>
    %118 = vector.shape_cast %117 : vector<1x64x128xbf16> to vector<64x128xbf16>
    %119 = vector.shape_cast %116 : vector<64x128xbf16> to vector<1x64x128xbf16>
    tpu.vector_store %arg10[%c0_141, %c0_142, %c0_143], %119 {strides = array<i32>} : memref<1x64x128xbf16, #tpu.memory_space<vmem>>, vector<1x64x128xbf16>,
    return
  }
  func.func @transform_0(%arg0: i32) -> (i32, i32, i32) {
    %c0_i32 = arith.constant 0 : i32
    %c0_i32_0 = arith.constant 0 : i32
    %c0_i32_1 = arith.constant 0 : i32
    return %arg0, %c0_i32, %c0_i32_0 : i32, i32, i32
  }
  func.func @transform_1(%arg0: i32) -> (i32, i32) {
    %c0_i32 = arith.constant 0 : i32
    %c0_i32_0 = arith.constant 0 : i32
    %c0_i32_1 = arith.constant 0 : i32
    return %c0_i32, %c0_i32_0 : i32, i32
  }
  func.func @transform_2(%arg0: i32) -> (i32, i32) {
    %c0_i32 = arith.constant 0 : i32
    %c0_i32_0 = arith.constant 0 : i32
    %c0_i32_1 = arith.constant 0 : i32
    return %c0_i32, %c0_i32_0 : i32, i32
  }
  func.func @transform_3(%arg0: i32) -> (i32, i32, i32, i32) {
    %c0_i32 = arith.constant 0 : i32
    %c0_i32_0 = arith.constant 0 : i32
    %c0_i32_1 = arith.constant 0 : i32
    %c0_i32_2 = arith.constant 0 : i32
    %c0_i32_3 = arith.constant 0 : i32
    return %c0_i32, %c0_i32_0, %c0_i32_1, %c0_i32_2 : i32, i32, i32, i32
  }
  func.func @transform_4(%arg0: i32) -> (i32, i32) {
    %c0_i32 = arith.constant 0 : i32
    %c0_i32_0 = arith.constant 0 : i32
    %c0_i32_1 = arith.constant 0 : i32
    return %c0_i32, %c0_i32_0 : i32, i32
  }
  func.func @transform_5(%arg0: i32) -> (i32, i32) {
    %c0_i32 = arith.constant 0 : i32
    %c0_i32_0 = arith.constant 0 : i32
    %c0_i32_1 = arith.constant 0 : i32
    return %c0_i32, %c0_i32_0 : i32, i32
  }
  func.func @transform_6(%arg0: i32) -> (i32, i32) {
    %c0_i32 = arith.constant 0 : i32
    %c0_i32_0 = arith.constant 0 : i32
    %c0_i32_1 = arith.constant 0 : i32
    return %c0_i32, %c0_i32_0 : i32, i32
  }
  func.func @transform_7(%arg0: i32) -> (i32, i32) {
    %c0_i32 = arith.constant 0 : i32
    %c0_i32_0 = arith.constant 0 : i32
    %c0_i32_1 = arith.constant 0 : i32
    return %c0_i32, %c0_i32_0 : i32, i32
  }
  func.func @transform_8(%arg0: i32) -> (i32, i32) {
    %c0_i32 = arith.constant 0 : i32
    %c0_i32_0 = arith.constant 0 : i32
    %c0_i32_1 = arith.constant 0 : i32
    return %c0_i32, %c0_i32_0 : i32, i32
  }
  func.func @transform_9(%arg0: i32) -> (i32, i32, i32) {
    %c0_i32 = arith.constant 0 : i32
    %c0_i32_0 = arith.constant 0 : i32
    %c0_i32_1 = arith.constant 0 : i32
    return %arg0, %c0_i32, %c0_i32_0 : i32, i32, i32
  }
}

</mosaic_0001>

<bundles_post_ra>
// kernel: tpu_custom_call.1
= control target key start
LH: loop header
LB: loop body
LE: loop exit
PB: predicated region body
PF: predicated region fallthrough
CT: control target
= control target key end

     0   :  { %s5451_s0 = inlined_call_operand.hbm [shape: bf16[2,256,128], index: 0, kind: input, shape index: {}]   ;;  %s5452_s1 = inlined_call_operand.hbm [shape: bf16[128,128], index: 1, kind: input, shape index: {}]   ;;  %s5453_s2 = inlined_call_operand.vmem [shape: f32[1,128], index: 2, kind: input, shape index: {}]   ;;  %s5454_s3 = inlined_call_operand.hbm [shape: bf16[3,3,128,128], index: 3, kind: input, shape index: {}]   ;;  %s5455_s4 = inlined_call_operand.vmem [shape: f32[1,128], index: 4, kind: input, shape index: {}]   ;;  %s5456_s5 = inlined_call_operand.hbm [shape: bf16[128,128], index: 5, kind: input, shape index: {}]   ;;  %s5457_s6 = inlined_call_operand.vmem [shape: f32[1,128], index: 6, kind: input, shape index: {}]   ;;  %s5458_s7 = inlined_call_operand.hbm [shape: bf16[128,128], index: 7, kind: input, shape index: {}]   ;;  %s5459_s8 = inlined_call_operand.vmem [shape: f32[1,128], index: 8, kind: input, shape index: {}]   ;;  %s5460_s9 = inlined_call_operand.hbm [shape: bf16[2,64,128], index: 9, kind: output, shape index: {}]  }
   0x1   :  { %5482 = sst [smem:[#allocation30_spill]] %s5452_s1 }
   0x2   :  { %5483 = sst [smem:[#allocation31_spill]] %s5454_s3 }
   0x3   :  { %5484 = sst [smem:[#allocation32_spill]] %s5456_s5 }
   0x4   :  { %14 = vsyncpa [#allocation4], 0 }
   0x5   :  { %16 = vsyncpa [#allocation4 + $0x1], 0 }
   0x6   :  { %17 = vsyncpa [#allocation7], 0 }
   0x7   :  { %18 = vsyncpa [#allocation10], 0 }
   0x8   :  { %19 = vsyncpa [#allocation5], 0 }
   0x9   :  { %21 = vsyncpa [#allocation5 + $0x1], 0  ;;  %s4854_s30 = smov 0   ;;  %s4856_s10 = smov 0  }
   0xa   :  { %s4858_s11 = smov 0   ;;  %s4860_s12 = smov 0  }
   0xb LB: > { %s4875_s13 = sadd.s32 4294967295, %s4791_s12   ;;  %s3591_s14 = sadd.s32 4294967294, %s4791_s12   ;;  %s4791_s12 = sphi %s4860_s12, %s5540_s12   ;;  %s4787_s11 = sphi %s4858_s11, %s5539_s11   ;;  %s4783_s10 = sphi %s4856_s10, %s5538_s10   ;;  %s4779_s30 = sphi %s4854_s30, %s5537_s30  }
   0xc   : > { %p47_p0 = scmp.ne.s32.totalorder %s4783_s10, %s4779_s30  ;;  %p5461_p1 = scmp.eq.s32.totalorder %s4875_s13, 0 }
   0xd   : > { %p239_p2 = scmp.eq.s32.totalorder %s4875_s13, 1  ;;  %p245_p3 = scmp.eq.s32.totalorder %s3591_s14, 1 }
   0xe   : > { %p4884_p4 = por %p5461_p1, %p47_p0  ;;  %p3592_p5 = scmp.ge.s32.totalorder %s4791_s12, 1 }
   0xf   : > { %p4889_p6 = por %p245_p3, %p47_p0  ;;  %p252_p7 = scmp.lt.s32.totalorder %s4791_s12, 3 }
  0x10   : > { %s5485_s15 = scalar_select %p4884_p4, 1, 0 }
  0x11   : > { %s5486_s16 = scalar_select %p4889_p6, 1, 0 }
  0x12   : > { %p4894_p8 = pnand %p3592_p5, %p252_p7  ;;  %s4793_s18 = smov [#allocation6]  }
  0x13   : > { %s264_s19 = sshll.u32 %s4793_s18, 4  ;;  %s4794_s21 = smov [#allocation9]   ;;  %s265_s19 = int_to_ptr.vmem [resolvable:$true] %s264_s19 }
  0x14   : > { %s5487_s17 = scalar_select %p4894_p8, 1, 0 }
  0x15   : > { %p4374_p9 = pneg %p4894_p8  ;;  %s296_s22 = sshll.u32 %s4794_s21, 4  ;;  %s297_s22 = int_to_ptr.vmem [resolvable:$true] %s296_s22 }
  0x16   : > { %s4795_s23 = smov [#allocation8]   ;;  %s4598_s25 = scalar_lea.vmem %s265_s19, 1024 }
  0x17   : > { %p4903_p11 = pnand %p4374_p9, %p5461_p1  ;;  %s280_s24 = sshll.u32 %s4795_s23, 4  ;;  %s281_s24 = int_to_ptr.vmem [resolvable:$true] %s280_s24 }
  0x18   : > { %p4599_p13 = scmp.ne.s32.totalorder %s265_s19, %s4598_s25  ;;  %p4606_p5 = scmp.lt.s32.totalorder %s265_s19, %s265_s19 }
  0x19   : > { %p4589_p12 = pneg %p4903_p11  ;;  %p4607_p7 = scmp.lt.s32.totalorder %s4598_s25, %s4598_s25 }
  0x1b   : > { %p4601_p0 = pnand %p4599_p13, %p4589_p12  ;;  %p4608_p9 = por %p4607_p7, %p4606_p5 }
  0x1d   : > { %p4602_p3 = pneg %p4601_p0 }
  0x1f   : > { %p4609_p10 = pnand %p4608_p9, %p4602_p3 }
  0x21   : > { %4612 = shalt.err (!%p4609_p10)
}
  0x22   : > { %s5462_s26 = smov 64   ;;  %s5463_s27 = smov 4  }
  0x23   : > { %s5489_s1 = sld [smem:[#allocation30_spill]]  ;;  %s4624_s14 = scalar_lea.vmem %s297_s22, 1024 }
  0x24   : > { %p4625_p13 = scmp.ne.s32.totalorder %s297_s22, %s4624_s14  ;;  %p4632_p3 = scmp.lt.s32.totalorder %s297_s22, %s297_s22 }
  0x25   : > { %p4633_p10 = scmp.lt.s32.totalorder %s4624_s14, %s4624_s14 }
  0x26   : > { %p4627_p0 = pnand %p4625_p13, %p4589_p12 }
  0x27   : > { %p4634_p7 = por %p4633_p10, %p4632_p3 }
  0x28   : > { %p4628_p5 = pneg %p4627_p0 }
  0x29   : > { %4377 = dma.hbm_to_vmem [thread:$0]  (!%p4903_p11), %s5489_s1, 1024, %s265_s19, [#allocation7], %s5462_s26, %s5462_s26, %s5463_s27  }
  0x2a   : > { %p4635_p9 = pnand %p4634_p7, %p4628_p5 }
  0x2c   : > { %4638 = shalt.err (!%p4635_p9)
}
  0x2d   : > { %s5490_s5 = sld [smem:[#allocation32_spill]]  ;;  %s4650_s19 = scalar_lea.vmem %s281_s24, 9216 }
  0x2e   : > { %p4651_p1 = scmp.ne.s32.totalorder %s281_s24, %s4650_s19  ;;  %p4658_p3 = scmp.lt.s32.totalorder %s281_s24, %s281_s24 }
  0x2f   : > { %p4659_p5 = scmp.lt.s32.totalorder %s4650_s19, %s4650_s19 }
  0x30   : > { %p4653_p13 = pnand %p4651_p1, %p4589_p12 }
  0x31   : > { %p4660_p10 = por %p4659_p5, %p4658_p3 }
  0x32   : > { %p4654_p0 = pneg %p4653_p13 }
  0x33   : > { %4383 = dma.hbm_to_vmem [thread:$0]  (!%p4903_p11), %s5490_s5, 1024, %s297_s22, [#allocation10], %s5462_s26, %s5462_s26, %s5463_s27  }
  0x34   : > { %p4661_p7 = pnand %p4660_p10, %p4654_p0 }
  0x36   : > { %4664 = shalt.err (!%p4661_p7)
}
  0x37   : > { %s5491_s3 = sld [smem:[#allocation31_spill]]  ;;  %s4798_s22 = smov [#allocation11]  }
  0x38   : > { %s312_s28 = sshll.u32 %s4798_s22, 4  ;;  %s313_s28 = int_to_ptr.vmem [resolvable:$true] %s312_s28 }
  0x39   : > { %s4676_s29 = scalar_lea.vmem %s313_s28, 1024  ;;  %p4684_p0 = scmp.lt.s32.totalorder %s313_s28, %s313_s28 }
  0x3a   : > { %p4677_p1 = scmp.ne.s32.totalorder %s313_s28, %s4676_s29  ;;  %p4685_p3 = scmp.lt.s32.totalorder %s4676_s29, %s4676_s29 }
  0x3c   : > { %p4679_p9 = pnand %p4677_p1, %p4589_p12  ;;  %p4686_p5 = por %p4685_p3, %p4684_p0 }
  0x3d   : > { %4380 = dma.hbm_to_vmem [thread:$0]  (!%p4903_p11), %s5491_s3, 9216, %s281_s24, [#allocation7], %s5462_s26, %s5462_s26, %s5463_s27  }
  0x3e   : > { %p4680_p13 = pneg %p4679_p9 }
  0x40   : > { %p4687_p10 = pnand %p4686_p5, %p4680_p13 }
  0x42   : > { %4690 = shalt.err (!%p4687_p10)
}
  0x43   : > { %4386 = dma.hbm_to_vmem [thread:$0]  (!%p4903_p11), %s5458_s7, 1024, %s313_s28, [#allocation10], %s5462_s26, %s5462_s26, %s5463_s27  }
  0x44   : > { %s4954_s18 = sadd.s32 1, %s4791_s12   ;;  %s34_s20 = sadd.s32 1, %s4787_s11 }
  0x45   : > { %s31_s21 = ssub.s32 %s4791_s12, %s4954_s18  ;;  %p41_p12 = scmp.ne.s32.totalorder %s4787_s11, %s4783_s10 }
  0x46   : > { %p32_p7 = scmp.eq.s32.totalorder %s31_s21, 0  ;;  %p42_p1 = scmp.eq.s32.totalorder %s4791_s12, 0 }
  0x47   : > { %p4964_p9 = por %p239_p2, %p41_p12  ;;  %p4399_p13 = scmp.lt.s32.totalorder %s4791_s12, 2 }
  0x48   : > { %s4970_s23 = scalar_select %p32_p7, %s4787_s11, %s34_s20  }
  0x49   : > { %s5492_s19 = scalar_select %p4964_p9, 1, 0 }
  0x4a   : > { %p43_p0 = por %p42_p1, %p41_p12  ;;  %s329_s25 = sand.u32 1, %s4787_s11  }
  0x4b   : > { %s3598_s22 = sshll.u32 %s329_s25, 7  ;;  %s3805_s28 = sshll.u32 %s4791_s12, 11 }
  0x4c   : > { %s4977_s14 = scalar_lea.hbm %s5451_s0, %s3805_s28  ;;  %s333_s21 = scalar_lea.vmem [#allocation3], %s3598_s22 }
  0x4d   : > { %s340_s26 = sshll.u32 %s333_s21, 4  ;;  %p4981_p2 = pnand %p4399_p13, %p43_p0  ;;  %s4979_s26 = int_to_ptr.vmem [resolvable:$true] %s340_s26 }
  0x4e   : > { %s4985_s20 = scalar_lea.sflag [#allocation4], %s329_s25  ;;  %s4691_s1 = scalar_lea.hbm %s4977_s14, 2048 }
  0x4f   : > { %p4692_p11 = scmp.ne.s32.totalorder %s4977_s14, %s4691_s1  ;;  %p4693_p3 = pneg %p4981_p2 }
  0x50   : > { %s4696_s22 = scalar_lea.hbm %s5451_s0, 4096  ;;  %p4697_p12 = scmp.lt.s32.totalorder %s4977_s14, %s5451_s0 }
  0x51   : > { %p4694_p5 = pnand %p4693_p3, %p4692_p11  ;;  %p4698_p7 = scmp.lt.s32.totalorder %s4696_s22, %s4691_s1 }
  0x53   : > { %p4695_p10 = pneg %p4694_p5  ;;  %p4699_p1 = por %p4698_p7, %p4697_p12 }
  0x55   : > { %p4700_p13 = pnand %p4699_p1, %p4695_p10 }
  0x57   : > { %4703 = shalt.err (!%p4700_p13)
}
  0x58   : > { %s4704_s25 = scalar_lea.vmem %s4979_s26, 2048  ;;  %s4799_s3 = smov [#allocation3]  }
  0x59   : > { %p4705_p0 = scmp.ne.s32.totalorder %s4979_s26, %s4704_s25  ;;  %s4709_s5 = sshll.u32 %s4799_s3, 4  ;;  %s4710_s5 = int_to_ptr.vmem [resolvable:$false] %s4709_s5 }
  0x5a   : > { %s4711_s28 = scalar_lea.vmem %s4710_s5, 4096  ;;  %p4712_p5 = scmp.lt.s32.totalorder %s4979_s26, %s4710_s5 }
  0x5b   : > { %p4707_p6 = pnand %p4705_p0, %p4693_p3  ;;  %p4713_p9 = scmp.lt.s32.totalorder %s4711_s28, %s4704_s25 }
  0x5d   : > { %p4708_p11 = pneg %p4707_p6  ;;  %p4714_p4 = por %p4713_p9, %p4712_p5 }
  0x5f   : > { %p4715_p8 = pnand %p4714_p4, %p4708_p11 }
  0x61   : > { %4718 = shalt.err (!%p4715_p8)
}
  0x62   : > { %s5494_s1 = smov 4   ;;  %s5495_s29 = smov 64  }
  0x63   : > { %4390 = dma.hbm_to_vmem [thread:$0]  (!%p4981_p2), %s4977_s14, 2048, %s4979_s26, %s4985_s20, %s5495_s29, %s5495_s29, %s5494_s1  }
  0x64   : > { %p5496_p6 = scmp.ne.s32.totalorder %s5487_s17, 0 }
  0x66   : > { %352 = sbr.rel (%p5496_p6) target bundleno = 1018 (0x3fa), region = 56 }
  0x6b   : > { %s5012_s3 = sand.u32 1, %s4783_s10   ;;  %p5497_p4 = scmp.ne.s32.totalorder %s5485_s15, 0 }
  0x6c   : > { %s3602_s5 = sshll.u32 %s5012_s3, 7  ;;  %s355_s22 = scalar_lea.sflag [#allocation4], %s5012_s3 }
  0x6d   : > { %s5016_s24 = scalar_lea.vmem [#allocation3], %s3602_s5 }
  0x6e   : > { %4762 = dma.done.wait (%p5497_p4), %s355_s22, 2048  }
  0x6f   : > { %4764 = vsyncadd (%p5497_p4), %s355_s22, 4294965248  ;;  %p5498_p8 = scmp.eq.s32.totalorder %s4875_s13, 0 }
  0x71   : > { %4766 = dma.done.wait (%p5498_p8), [#allocation7], 10240   ;;  %p5499_p9 = pmov %p5498_p8 }
  0x72   : > { %p5500_p2 = pmov %p5498_p8 }
  0x73   : > { %4768 = vsyncadd (%p5499_p9), [#allocation7], 4294957056 }
  0x74   : > { %4770 = dma.done.wait (%p5500_p2), [#allocation10], 2048   ;;  %p5501_p3 = pmov %p5500_p2 }
  0x75   : > { %vm962_vm0 = vcmask 1040384   ;;  %vm963_vm1 = vsmask.f32 256  ;;  %v1201_v1 = vld [vmem:[#allocation2 + $0x4c] sm:$0x1]  ;;  %v4446_v5 = vld [vmem:[#allocation6 + $0x38] sm:$0xff]  }
  0x76   : > { %4772 = vsyncadd (%p5501_p3), [#allocation10], 4294965248  ;;  %v1255_v2 = vld [vmem:[#allocation2 + $0xd0] sm:$0x1]  ;;  %4026 = vmatprep.subr.bf16.mxu0 %v4446_v5  ;;  %v4448_v7 = vld [vmem:[#allocation6 + $0x28] sm:$0xff]   ;;  %v4800_v29 = vmov 0  }
  0x77   : > { %vm5030_vm2 = vmand %vm962_vm0, %vm963_vm1  ;;  %v4447_v6 = vld [vmem:[#allocation6 + $0x30] sm:$0xff]   ;;  %4027 = vmatpush3.bf16.msra.mxu0 %v4446_v5  ;;  %v4449_v8 = vld [vmem:[#allocation6 + $0x20] sm:$0xff]   ;;  %1196 = vst [vmem:[#allocation2] sm:$0xf] %v4800_v29  ;;  %vm956_vm3 = vcmask 1043456   ;;  %s3607_s28 = sshll.u32 %s5012_s3, 5 }
  0x78   : > { %v1202_v3 = vsel %vm5030_vm2, 0, %v1201_v1  ;;  %v1256_v4 = vsel %vm5030_vm2, 0, %v1255_v2  ;;  %4028 = vmatprep.subr.bf16.mxu0 %v4447_v6  ;;  %v4454_v9 = vld [vmem:[%s5016_s24] sm:$0xff]   ;;  %v4450_v10 = vld [vmem:[#allocation6 + $0x18] sm:$0xff]   ;;  %v4451_v11 = vld [vmem:[#allocation6 + $0x10] sm:$0xff]   ;;  %s5395_s1 = scalar_lea.vmem [#allocation12], %s3607_s28 }
  0x79   : > { %1203 = vst [vmem:[#allocation2 + $0x4c] sm:$0x1] %v1202_v3  ;;  %1257 = vst [vmem:[#allocation2 + $0xd0] sm:$0x1] %v1256_v4  ;;  %4042 = vmatprep.mubr.bf16.mxu0 %v4454_v9  ;;  %v4452_v12 = vld [vmem:[#allocation6 + $0x8] sm:$0xff]   ;;  %v4453_v13 = vld [vmem:[#allocation6] sm:$0xff]  }
  0x7a   : > { %v4455_v14 = vld [vmem:[%s5016_s24 + $0x8] sm:$0xff]   ;;  %v4456_v15 = vld [vmem:[%s5016_s24 + $0x10] sm:$0xff]   ;;  %v4457_v16 = vld [vmem:[%s5016_s24 + $0x18] sm:$0xff]   ;;  %1200 = vst [vmem:[#allocation2 + $0x48] sm:$0xf] %v4800_v29  ;;  %s3480_s29 = sshll.u32 %s5395_s1, 4  ;;  %s5401_s29 = int_to_ptr.vmem [resolvable:$true] %s3480_s29 }
  0x7b   : > { %4029 = vmatpush3.bf16.msra.mxu0 %v4447_v6  ;;  %v4458_v17 = vld [vmem:[%s5016_s24 + $0x20] sm:$0xff]   ;;  %v4459_v18 = vld [vmem:[%s5016_s24 + $0x28] sm:$0xff]   ;;  %v4460_v19 = vld [vmem:[%s5016_s24 + $0x30] sm:$0xff]   ;;  %vm957_vm4 = vsmask.f32 7938  ;;  %s3846_s5 = sshll.u32 %s4875_s13, 9 }
  0x7c   : > { %4030 = vmatprep.subr.bf16.mxu0 %v4448_v7  ;;  %v4461_v20 = vld [vmem:[%s5016_s24 + $0x38] sm:$0xff]   ;;  %v4462_v21 = vld [vmem:[%s5016_s24 + $0x40] sm:$0xff]   ;;  %v4463_v22 = vld [vmem:[%s5016_s24 + $0x48] sm:$0xff]   ;;  %vm1613_vm6 = vsmask.f32 3328  ;;  %s5406_s15 = scalar_lea.hbm %s5460_s9, %s3846_s5  ;;  %s3467_s17 = scalar_lea.sflag [#allocation5], %s5012_s3 }
  0x7d   : > { %v4464_v23 = vld [vmem:[%s5016_s24 + $0x50] sm:$0xff]   ;;  %v4465_v24 = vld [vmem:[%s5016_s24 + $0x58] sm:$0xff]   ;;  %v4466_v25 = vld [vmem:[%s5016_s24 + $0x60] sm:$0xff]   ;;  %vm1614_vm7 = vsmask.f32 7440  ;;  %s4719_s26 = scalar_lea.vmem %s5401_s29, 512 }
  0x7e   : > { %v4467_v26 = vld [vmem:[%s5016_s24 + $0x68] sm:$0xff]   ;;  %v4468_v27 = vld [vmem:[%s5016_s24 + $0x70] sm:$0xff]   ;;  %v4469_v28 = vld [vmem:[%s5016_s24 + $0x78] sm:$0xff]   ;;  %p4720_p10 = scmp.ne.s32.totalorder %s5401_s29, %s4719_s26  ;;  %p5534_p12 = scmp.ne.s32.totalorder %s5492_s19, 0 }
  0x7f   : > { %4031 = vmatpush3.bf16.msra.mxu0 %v4448_v7  ;;  %v4470_v30 = vld [vmem:[#allocation8 + $0x38] sm:$0xff]   ;;  %v4472_v31 = vld [vmem:[#allocation8 + $0x30] sm:$0xff]   ;;  %v4473_v32 = vld [vmem:[#allocation8 + $0x28] sm:$0xff]   ;;  %s4801_s13 = smov [#allocation12]  }
  0x80   : > { %4032 = vmatprep.subr.bf16.mxu0 %v4449_v8  ;;  %4074 = vmatprep.subr.bf16.mxu1 %v4470_v30  ;;  %v4471_v33 = vld [vmem:[#allocation8 + $0xb8] sm:$0xff]   ;;  %v4475_v34 = vld [vmem:[#allocation8 + $0x20] sm:$0xff]   ;;  %v4474_v35 = vld [vmem:[#allocation8 + $0xb0] sm:$0xff]   ;;  %p4721_p7 = pnand %p4720_p10, %p5534_p12  ;;  %s4723_s27 = sshll.u32 %s4801_s13, 4  ;;  %s4724_s27 = int_to_ptr.vmem [resolvable:$false] %s4723_s27 }
  0x81   : > { %4075 = vmatpush3.bf16.msra.mxu1 %v4470_v30  ;;  %v4476_v36 = vld [vmem:[#allocation8 + $0x18] sm:$0xff]   ;;  %v4477_v37 = vld [vmem:[#allocation8 + $0xa8] sm:$0xff]   ;;  %v4478_v38 = vld [vmem:[#allocation8 + $0x10] sm:$0xff]   ;;  %s4725_s14 = scalar_lea.vmem %s4724_s27, 1024  ;;  %p4726_p13 = scmp.lt.s32.totalorder %s5401_s29, %s4724_s27 }
  0x82   : > { %4076 = vmatprep.subr.bf16.mxu1 %v4472_v31  ;;  %v1204_v39 = vld [vmem:[#allocation2] sm:$0x1]  ;;  %v4480_v42 = vld [vmem:[#allocation8 + $0x8] sm:$0xff]   ;;  %v1197_v43 = vld [vmem:[#allocation2 + $0x4] sm:$0x1]  ;;  %p4722_p1 = pneg %p4721_p7  ;;  %p4727_p0 = scmp.lt.s32.totalorder %s4725_s14, %s4719_s26 }
  0x83   : > { %4033 = vmatpush3.bf16.msra.mxu0 %v4449_v8  ;;  %v1205_v40 = vsel %vm5030_vm2, 0, %v1204_v39  ;;  %v4479_v41 = vld [vmem:[#allocation8 + $0xa0] sm:$0xff]   ;;  %v1198_v44 = vsel %vm5030_vm2, 0, %v1197_v43  ;;  %v4481_v45 = vld [vmem:[#allocation8 + $0x98] sm:$0xff]   ;;  %v4484_v47 = vld [vmem:[#allocation8 + $0x90] sm:$0xff]  }
  0x84   : > { %4034 = vmatprep.subr.bf16.mxu0 %v4450_v10  ;;  %1206 = vst [vmem:[#allocation2] sm:$0x1] %v1205_v40  ;;  %1199 = vst [vmem:[#allocation2 + $0x4] sm:$0x1] %v1198_v44  ;;  %v4482_v46 = vld [vmem:[#allocation8] sm:$0xff]   ;;  %v5058_v48 = vld [vmem:[#allocation8 + $0x78] sm:$0xff]   ;;  %p4728_p11 = por %p4727_p0, %p4726_p13 }
  0x85   : > { %4077 = vmatpush3.bf16.msra.mxu1 %v4472_v31  ;;  %v4487_v49 = vld [vmem:[#allocation8 + $0x88] sm:$0xff]   ;;  %v4490_v50 = vld [vmem:[#allocation8 + $0x80] sm:$0xff]   ;;  %v4493_v51 = vld [vmem:[#allocation8 + $0x138] sm:$0xff]  }
  0x86   : > { %4078 = vmatprep.subr.bf16.mxu1 %v4473_v32  ;;  %v5064_v52 = vld [vmem:[%s5453_s2] ss:$0 sm:$0xff]  ;;  %vm5078_vm5 = vmand %vm956_vm3, %vm957_vm4  ;;  %v977_v43 = vld [vmem:[#allocation2 + $0xa4] sm:$0x1]  ;;  %p4729_p5 = pnand %p4728_p11, %p4722_p1 }
  0x87   : > { %4035 = vmatpush3.bf16.msra.mxu0 %v4450_v10  ;;  %v974_v39 = vld [vmem:[#allocation2 + $0xa0] sm:$0xf]  ;;  %vm5211_vm8 = vmor %vm1613_vm6, %vm1614_vm7 }
  0x88   : > { %4036 = vmatprep.subr.bf16.mxu0 %v4451_v11 }
  0x89   : > { %4079 = vmatpush3.bf16.msra.mxu1 %v4473_v32 }
  0x8a   : > { %4080 = vmatprep.subr.bf16.mxu1 %v4475_v34 }
  0x8b   : > { %4037 = vmatpush3.bf16.msra.mxu0 %v4451_v11 }
  0x8c   : > { %4038 = vmatprep.subr.bf16.mxu0 %v4452_v12 }
  0x8d   : > { %4081 = vmatpush3.bf16.msra.mxu1 %v4475_v34 }
  0x8e   : > { %4082 = vmatprep.subr.bf16.mxu1 %v4476_v36 }
  0x8f   : > { %4039 = vmatpush3.bf16.msra.mxu0 %v4452_v12 }
  0x90   : > { %4040 = vmatprep.subr.bf16.mxu0 %v4453_v13 }
  0x91   : > { %4083 = vmatpush3.bf16.msra.mxu1 %v4476_v36 }
  0x92   : > { %4084 = vmatprep.subr.bf16.mxu1 %v4478_v38 }
  0x93   : > { %4041 = vmatpush3.bf16.msra.mxu0 %v4453_v13 }
  0x94   : > { %4122 = vmatprep.subr.bf16.mxu0 %v4471_v33 }
  0x95   : > { %4085 = vmatpush3.bf16.msra.mxu1 %v4478_v38 }
  0x96   : > { %4043 = vmatmul.mubr.bf16.vlgmr.msra.gmra.mxu0 %v4455_v14  ;;  %4086 = vmatprep.subr.bf16.mxu1 %v4480_v42 }
  0x97   : > { %4046 = vmatprep.mubr.bf16.mxu0 %v4456_v15  ;;  %4123 = vmatpush3.bf16.msra.mxu0 %v4471_v33 }
  0x98   : > { %4124 = vmatprep.subr.bf16.mxu0 %v4474_v35 }
  0x99   : > { %4087 = vmatpush3.bf16.msra.mxu1 %v4480_v42 }
  0x9a   : > { %4088 = vmatprep.subr.bf16.mxu1 %v4482_v46 }
  0x9b   : > { %4125 = vmatpush3.bf16.msra.mxu0 %v4474_v35 }
  0x9c   : > { %4126 = vmatprep.subr.bf16.mxu0 %v4477_v37 }
  0x9d   : > { %4089 = vmatpush3.bf16.msra.mxu1 %v4482_v46 }
  0x9e   : > { %4047 = vmatmul.mubr.bf16.gmra.mxu0 %v4457_v16  ;;  %4098 = vmatprep.subr.bf16.mxu1 %v5058_v48 }
  0x9f   : > { %4050 = vmatprep.mubr.bf16.mxu0 %v4458_v17  ;;  %4127 = vmatpush3.bf16.msra.mxu0 %v4477_v37 }
  0xa0   : > { %4128 = vmatprep.subr.bf16.mxu0 %v4479_v41 }
  0xa3   : > { %4129 = vmatpush3.bf16.msra.mxu0 %v4479_v41 }
  0xa4   : > { %4130 = vmatprep.subr.bf16.mxu0 %v4481_v45 }
  0xa6   : > { %4051 = vmatmul.mubr.bf16.gmra.mxu0 %v4459_v18 }
  0xa7   : > { %4054 = vmatprep.mubr.bf16.mxu0 %v4460_v19  ;;  %4131 = vmatpush3.bf16.msra.mxu0 %v4481_v45 }
  0xa8   : > { %4132 = vmatprep.subr.bf16.mxu0 %v4484_v47 }
  0xab   : > { %4133 = vmatpush3.bf16.msra.mxu0 %v4484_v47 }
  0xac   : > { %4134 = vmatprep.subr.bf16.mxu0 %v4487_v49 }
  0xae   : > { %4055 = vmatmul.mubr.bf16.gmra.mxu0 %v4461_v20 }
  0xaf   : > { %4058 = vmatprep.mubr.bf16.mxu0 %v4462_v21  ;;  %4135 = vmatpush3.bf16.msra.mxu0 %v4487_v49 }
  0xb0   : > { %4136 = vmatprep.subr.bf16.mxu0 %v4490_v50 }
  0xb3   : > { %4137 = vmatpush3.bf16.msra.mxu0 %v4490_v50 }
  0xb4   : > { %4170 = vmatprep.subr.bf16.mxu0 %v4493_v51 }
  0xb6   : > { %4059 = vmatmul.mubr.bf16.gmra.mxu0 %v4463_v22 }
  0xb7   : > { %4062 = vmatprep.mubr.bf16.mxu0 %v4464_v23 }
  0xbe   : > { %4063 = vmatmul.mubr.bf16.gmra.mxu0 %v4465_v24 }
  0xbf   : > { %4066 = vmatprep.mubr.bf16.mxu0 %v4466_v25 }
  0xc6   : > { %4067 = vmatmul.mubr.bf16.gmra.mxu0 %v4467_v26 }
  0xc7   : > { %4070 = vmatprep.mubr.bf16.mxu0 %v4468_v27 }
  0xce   : > { %4071 = vmatmul.mubr.bf16.gmra.mxu0 %v4469_v28 }
 0x156   : > { %v4044_v53 = vpop.f32.mrf.mxu0 }
 0x157   : > { %v652_v54 = vadd.f32 %v4044_v53, %v5064_v52  ;;  %v959_v53 = vld [vmem:[#allocation2 + $0x90] sm:$0xf] }
 0x158   : > { %v643_v55 = vpop.f32.mrf.mxu0 }
 0x159   : > { %v772_v56 = vmax.f32 %v652_v54, 0.0  ;;  %v644_v57 = vadd.f32 %v5064_v52, %v643_v55  ;;  %v965_v55 = vld [vmem:[#allocation2 + $0x94] sm:$0x1] }
 0x15a   : > { %v4045_v58 = vpop.f32.mrf.mxu0 }
 0x15b   : > { %v3808_v59 = vpack.c.bf16 %v772_v56, %v772_v56  ;;  %v770_v60 = vmax.f32 %v644_v57, 0.0  ;;  %v655_v61 = vadd.f32 %v4045_v58, %v5064_v52 }
 0x15c   : > { %v646_v62 = vpop.f32.mrf.mxu0 }
 0x15d   : > { %849 = vst [vmem:[#allocation2 + $0xe8] sm:$0xf] %v3808_v59  ;;  %v3806_v63 = vpack.c.bf16 %v770_v60, %v770_v60  ;;  %v773_v1 = vmax.f32 %v655_v61, 0.0  ;;  %v647_v2 = vadd.f32 %v5064_v52, %v646_v62 }
 0x15e   : > { %v4048_v3 = vpop.f32.mrf.mxu0 }
 0x15f   : > { %847 = vst [vmem:[#allocation2 + $0xd8] sm:$0xf] %v3806_v63  ;;  %v3809_v4 = vpack.c.bf16 %v773_v1, %v773_v1  ;;  %v771_v5 = vmax.f32 %v647_v2, 0.0  ;;  %v668_v6 = vadd.f32 %v4048_v3, %v5064_v52 }
 0x160   : > { %v659_v7 = vpop.f32.mrf.mxu0 }
 0x161   : > { %850 = vst [vmem:[#allocation2 + $0xf0] sm:$0xf] %v3809_v4  ;;  %v3807_v8 = vpack.c.bf16 %v771_v5, %v771_v5  ;;  %v776_v9 = vmax.f32 %v668_v6, 0.0  ;;  %v660_v10 = vadd.f32 %v5064_v52, %v659_v7 }
 0x162   : > { %v4049_v11 = vpop.f32.mrf.mxu0 }
 0x163   : > { %848 = vst [vmem:[#allocation2 + $0xe0] sm:$0xf] %v3807_v8  ;;  %v3812_v12 = vpack.c.bf16 %v776_v9, %v776_v9  ;;  %v774_v13 = vmax.f32 %v660_v10, 0.0  ;;  %v671_v14 = vadd.f32 %v4049_v11, %v5064_v52  ;;  %v980_v9 = vld [vmem:[#allocation2 + $0xa8] sm:$0xf] }
 0x164   : > { %v662_v15 = vpop.f32.mrf.mxu0  ;;  %v983_v10 = vld [vmem:[#allocation2 + $0xac] sm:$0x1] }
 0x165   : > { %853 = vst [vmem:[#allocation2 + $0x108] sm:$0xf] %v3812_v12  ;;  %v3810_v16 = vpack.c.bf16 %v774_v13, %v774_v13  ;;  %v777_v17 = vmax.f32 %v671_v14, 0.0  ;;  %v663_v18 = vadd.f32 %v5064_v52, %v662_v15 }
 0x166   : > { %v4052_v19 = vpop.f32.mrf.mxu0 }
 0x167   : > { %851 = vst [vmem:[#allocation2 + $0xf8] sm:$0xf] %v3810_v16  ;;  %v3813_v20 = vpack.c.bf16 %v777_v17, %v777_v17  ;;  %v775_v21 = vmax.f32 %v663_v18, 0.0  ;;  %v684_v22 = vadd.f32 %v4052_v19, %v5064_v52  ;;  %v968_v18 = vld [vmem:[#allocation2 + $0x98] sm:$0xf] }
 0x168   : > { %v675_v23 = vpop.f32.mrf.mxu0  ;;  %v971_v19 = vld [vmem:[#allocation2 + $0x9c] sm:$0x1] }
 0x169   : > { %854 = vst [vmem:[#allocation2 + $0x110] sm:$0xf] %v3813_v20  ;;  %v3811_v24 = vpack.c.bf16 %v775_v21, %v775_v21  ;;  %v780_v25 = vmax.f32 %v684_v22, 0.0  ;;  %v676_v26 = vadd.f32 %v5064_v52, %v675_v23 }
 0x16a   : > { %v4053_v27 = vpop.f32.mrf.mxu0 }
 0x16b   : > { %852 = vst [vmem:[#allocation2 + $0x100] sm:$0xf] %v3811_v24  ;;  %v3816_v28 = vpack.c.bf16 %v780_v25, %v780_v25  ;;  %v778_v29 = vmax.f32 %v676_v26, 0.0  ;;  %v687_v30 = vadd.f32 %v4053_v27, %v5064_v52 }
 0x16c   : > { %v678_v31 = vpop.f32.mrf.mxu0 }
 0x16d   : > { %v892_v32 = vshrl.u32 %v3816_v28, 16  ;;  %v3814_v33 = vpack.c.bf16 %v778_v29, %v778_v29  ;;  %v781_v34 = vmax.f32 %v687_v30, 0.0  ;;  %v679_v35 = vadd.f32 %v5064_v52, %v678_v31  ;;  %v998_v30 = vld [vmem:[#allocation2 + $0xc0] sm:$0xf] }
 0x16e   : > { %v4056_v36 = vpop.f32.mrf.mxu0  ;;  %v895_v38 = vshll.u32 %v3816_v28, 16 }
 0x16f   : > { %v894_v37 = vrot.slane %v892_v32, 7  ;;  %v876_v40 = vshrl.u32 %v3814_v33, 16  ;;  %v3817_v41 = vpack.c.bf16 %v781_v34, %v781_v34  ;;  %v879_v44 = vshll.u32 %v3814_v33, 16 }
 0x170   : > { %v779_v45 = vmax.f32 %v679_v35, 0.0  ;;  %v700_v46 = vadd.f32 %v4056_v36, %v5064_v52  ;;  %v691_v47 = vpop.f32.mrf.mxu0  ;;  %v1001_v36 = vld [vmem:[#allocation2 + $0xc4] sm:$0x1] }
 0x171   : > { %v897_v49 = vor.u32 %v895_v38, %v894_v37  ;;  %v898_v50 = vrot.slane %v894_v37, 4  ;;  %v878_v51 = vrot.slane %v876_v40, 7  ;;  %v900_v54 = vshrl.u32 %v3817_v41, 16  ;;  %v986_v37 = vld [vmem:[#allocation2 + $0xb0] sm:$0xf] }
 0x172   : > { %v903_v56 = vshll.u32 %v3817_v41, 16  ;;  %v3815_v57 = vpack.c.bf16 %v779_v45, %v779_v45  ;;  %v784_v58 = vmax.f32 %v700_v46, 0.0  ;;  %v692_v59 = vadd.f32 %v5064_v52, %v691_v47  ;;  %v4057_v60 = vpop.f32.mrf.mxu0 }
 0x173   : > { %v975_v61 = vsel %vm5078_vm5, %v897_v49, %v974_v39  ;;  %v978_v62 = vsel %vm5030_vm2, %v898_v50, %v977_v43  ;;  %v881_v63 = vor.u32 %v879_v44, %v878_v51  ;;  %v882_v1 = vrot.slane %v878_v51, 4  ;;  %v989_v49 = vld [vmem:[#allocation2 + $0xb4] sm:$0x1] }
 0x174   : > { %976 = vst [vmem:[#allocation2 + $0xa0] sm:$0xf] %v975_v61  ;;  %979 = vst [vmem:[#allocation2 + $0xa4] sm:$0x1] %v978_v62  ;;  %v902_v2 = vrot.slane %v900_v54, 7  ;;  %v884_v3 = vshrl.u32 %v3815_v57, 16  ;;  %v3820_v5 = vpack.c.bf16 %v784_v58, %v784_v58  ;;  %v694_v6 = vpop.f32.mrf.mxu0  ;;  %v703_v12 = vadd.f32 %v4057_v60, %v5064_v52 }
 0x175   : > { %v887_v4 = vshll.u32 %v3815_v57, 16  ;;  %v960_v7 = vsel %vm5078_vm5, %v881_v63, %v959_v53  ;;  %v966_v8 = vsel %vm5030_vm2, %v882_v1, %v965_v55  ;;  %v782_v11 = vmax.f32 %v692_v59, 0.0 }
 0x176   : > { %961 = vst [vmem:[#allocation2 + $0x90] sm:$0xf] %v960_v7  ;;  %967 = vst [vmem:[#allocation2 + $0x94] sm:$0x1] %v966_v8  ;;  %v905_v13 = vor.u32 %v903_v56, %v902_v2  ;;  %v906_v14 = vrot.slane %v902_v2, 4  ;;  %v886_v15 = vrot.slane %v884_v3, 7  ;;  %v4060_v17 = vpop.f32.mrf.mxu0  ;;  %v695_v23 = vadd.f32 %v5064_v52, %v694_v6 }
 0x177   : > { %v924_v16 = vshrl.u32 %v3820_v5, 16  ;;  %v927_v20 = vshll.u32 %v3820_v5, 16  ;;  %v3818_v21 = vpack.c.bf16 %v782_v11, %v782_v11  ;;  %v785_v22 = vmax.f32 %v703_v12, 0.0  ;;  %v1007_v5 = vld [vmem:[#allocation2 + $0xcc] sm:$0x1] }
 0x178   : > { %v981_v24 = vsel %vm5078_vm5, %v905_v13, %v980_v9  ;;  %v984_v25 = vsel %vm5030_vm2, %v906_v14, %v983_v10  ;;  %v889_v26 = vor.u32 %v887_v4, %v886_v15  ;;  %v890_v27 = vrot.slane %v886_v15, 4  ;;  %v707_v28 = vpop.f32.mrf.mxu0  ;;  %v1004_v4 = vld [vmem:[#allocation2 + $0xc8] sm:$0xf]  ;;  %v992_v15 = vld [vmem:[#allocation2 + $0xb8] sm:$0xf] }
 0x179   : > { %982 = vst [vmem:[#allocation2 + $0xa8] sm:$0xf] %v981_v24  ;;  %985 = vst [vmem:[#allocation2 + $0xac] sm:$0x1] %v984_v25  ;;  %v926_v29 = vrot.slane %v924_v16, 7  ;;  %v908_v31 = vshrl.u32 %v3818_v21, 16  ;;  %v3821_v33 = vpack.c.bf16 %v785_v22, %v785_v22  ;;  %v716_v39 = vadd.f32 %v4060_v17, %v5064_v52 }
 0x17a   : > { %v911_v32 = vshll.u32 %v3818_v21, 16  ;;  %v969_v34 = vsel %vm5078_vm5, %v889_v26, %v968_v18  ;;  %v972_v35 = vsel %vm5030_vm2, %v890_v27, %v971_v19  ;;  %v783_v38 = vmax.f32 %v695_v23, 0.0  ;;  %v4061_v40 = vpop.f32.mrf.mxu0  ;;  %v995_v16 = vld [vmem:[#allocation2 + $0xbc] sm:$0x1] }
 0x17b   : > { %v1237_v41 = vld [vmem:[#allocation2 + $0xa0] sm:$0x1]  ;;  %970 = vst [vmem:[#allocation2 + $0x98] sm:$0xf] %v969_v34  ;;  %973 = vst [vmem:[#allocation2 + $0x9c] sm:$0x1] %v972_v35  ;;  %v929_v43 = vor.u32 %v927_v20, %v926_v29  ;;  %v708_v7 = vadd.f32 %v5064_v52, %v707_v28  ;;  %v719_v12 = vadd.f32 %v4061_v40, %v5064_v52 }
 0x17c   : > { %v930_v44 = vrot.slane %v926_v29, 4  ;;  %v910_v45 = vrot.slane %v908_v31, 7  ;;  %v932_v46 = vshrl.u32 %v3821_v33, 16  ;;  %v1238_v47 = vsel %vm5030_vm2, 0, %v1237_v41  ;;  %v710_v54 = vpop.f32.mrf.mxu0 }
 0x17d   : > { %v935_v50 = vshll.u32 %v3821_v33, 16  ;;  %v3819_v51 = vpack.c.bf16 %v783_v38, %v783_v38  ;;  %v788_v53 = vmax.f32 %v716_v39, 0.0  ;;  %1239 = vst [vmem:[#allocation2 + $0xa0] sm:$0x1] %v1238_v47  ;;  %v1231_v55 = vld [vmem:[#allocation2 + $0x90] sm:$0x1]  ;;  %v999_v56 = vsel %vm5078_vm5, %v929_v43, %v998_v30 }
 0x17e   : > { %v1002_v57 = vsel %vm5030_vm2, %v930_v44, %v1001_v36  ;;  %v913_v58 = vor.u32 %v911_v32, %v910_v45  ;;  %v914_v59 = vrot.slane %v910_v45, 4  ;;  %v1232_v60 = vsel %vm5030_vm2, 0, %v1231_v55  ;;  %1000 = vst [vmem:[#allocation2 + $0xc0] sm:$0xf] %v999_v56  ;;  %v4064_v1 = vpop.f32.mrf.mxu0 }
 0x17f   : > { %1003 = vst [vmem:[#allocation2 + $0xc4] sm:$0x1] %v1002_v57  ;;  %v934_v61 = vrot.slane %v932_v46, 7  ;;  %v916_v62 = vshrl.u32 %v3819_v51, 16  ;;  %v919_v63 = vshll.u32 %v3819_v51, 16  ;;  %v3824_v6 = vpack.c.bf16 %v788_v53, %v788_v53 }
 0x180   : > { %1233 = vst [vmem:[#allocation2 + $0x90] sm:$0x1] %v1232_v60  ;;  %v987_v2 = vsel %vm5078_vm5, %v913_v58, %v986_v37  ;;  %v990_v3 = vsel %vm5030_vm2, %v914_v59, %v989_v49  ;;  %v1240_v8 = vld [vmem:[#allocation2 + $0xa8] sm:$0x1]  ;;  %v723_v13 = vpop.f32.mrf.mxu0  ;;  %v786_v17 = vmax.f32 %v708_v7, 0.0  ;;  %v711_v18 = vadd.f32 %v5064_v52, %v710_v54 }
 0x181   : > { %988 = vst [vmem:[#allocation2 + $0xb0] sm:$0xf] %v987_v2  ;;  %991 = vst [vmem:[#allocation2 + $0xb4] sm:$0x1] %v990_v3  ;;  %v937_v9 = vor.u32 %v935_v50, %v934_v61  ;;  %v938_v10 = vrot.slane %v934_v61, 4  ;;  %v918_v11 = vrot.slane %v916_v62, 7  ;;  %v732_v19 = vadd.f32 %v4064_v1, %v5064_v52 }
 0x182   : > { %v1241_v14 = vsel %vm5030_vm2, 0, %v1240_v8  ;;  %1041 = vst [vmem:[#allocation2 + $0x60] sm:$0xf] %v3824_v6  ;;  %v1234_v20 = vld [vmem:[#allocation2 + $0x98] sm:$0x1]  ;;  %v4065_v25 = vpop.f32.mrf.mxu0  ;;  %v3822_v27 = vpack.c.bf16 %v786_v17, %v786_v17  ;;  %v789_v28 = vmax.f32 %v719_v12, 0.0  ;;  %v724_v33 = vadd.f32 %v5064_v52, %v723_v13 }
 0x183   : > { %1242 = vst [vmem:[#allocation2 + $0xa8] sm:$0x1] %v1241_v14  ;;  %v1005_v21 = vsel %vm5078_vm5, %v937_v9, %v1004_v4  ;;  %v1008_v22 = vsel %vm5030_vm2, %v938_v10, %v1007_v5  ;;  %v921_v23 = vor.u32 %v919_v63, %v918_v11  ;;  %v922_v24 = vrot.slane %v918_v11, 4  ;;  %v5143_v1 = vld [vmem:[#allocation2] sm:$0xf] }
 0x184   : > { %v1235_v26 = vsel %vm5030_vm2, 0, %v1234_v20  ;;  %1006 = vst [vmem:[#allocation2 + $0xc8] sm:$0xf] %v1005_v21  ;;  %1009 = vst [vmem:[#allocation2 + $0xcc] sm:$0x1] %v1008_v22  ;;  %v787_v29 = vmax.f32 %v711_v18, 0.0  ;;  %v726_v34 = vpop.f32.mrf.mxu0  ;;  %v3825_v36 = vpack.c.bf16 %v789_v28, %v789_v28  ;;  %v735_v38 = vadd.f32 %v4065_v25, %v5064_v52 }
 0x185   : > { %1236 = vst [vmem:[#allocation2 + $0x98] sm:$0x1] %v1235_v26  ;;  %v993_v30 = vsel %vm5078_vm5, %v921_v23, %v992_v15  ;;  %v996_v31 = vsel %vm5030_vm2, %v922_v24, %v995_v16  ;;  %v792_v32 = vmax.f32 %v732_v19, 0.0  ;;  %v1249_v35 = vld [vmem:[#allocation2 + $0xc0] sm:$0x1]  ;;  %v727_v39 = vadd.f32 %v5064_v52, %v726_v34 }
 0x186   : > { %994 = vst [vmem:[#allocation2 + $0xb8] sm:$0xf] %v993_v30  ;;  %997 = vst [vmem:[#allocation2 + $0xbc] sm:$0x1] %v996_v31  ;;  %v3823_v37 = vpack.c.bf16 %v787_v29, %v787_v29  ;;  %v1250_v40 = vsel %vm5030_vm2, 0, %v1249_v35  ;;  %v790_v43 = vmax.f32 %v724_v33, 0.0  ;;  %v4068_v44 = vpop.f32.mrf.mxu0 }
 0x187   : > { %1039 = vst [vmem:[#allocation2 + $0x50] sm:$0xf] %v3822_v27  ;;  %v3828_v41 = vpack.c.bf16 %v792_v32, %v792_v32  ;;  %1251 = vst [vmem:[#allocation2 + $0xc0] sm:$0x1] %v1250_v40  ;;  %v793_v46 = vmax.f32 %v735_v38, 0.0  ;;  %v791_v47 = vmax.f32 %v727_v39, 0.0  ;;  %v748_v49 = vadd.f32 %v4068_v44, %v5064_v52 }
 0x188   : > { %v1243_v45 = vld [vmem:[#allocation2 + $0xb0] sm:$0x1]  ;;  %1042 = vst [vmem:[#allocation2 + $0x68] sm:$0xf] %v3825_v36  ;;  %1040 = vst [vmem:[#allocation2 + $0x58] sm:$0xf] %v3823_v37  ;;  %v3826_v51 = vpack.c.bf16 %v790_v43, %v790_v43  ;;  %v739_v53 = vpop.f32.mrf.mxu0 }
 0x189   : > { %v1244_v50 = vsel %vm5030_vm2, 0, %v1243_v45  ;;  %1045 = vst [vmem:[#allocation2 + $0x80] sm:$0xf] %v3828_v41  ;;  %v3829_v54 = vpack.c.bf16 %v793_v46, %v793_v46  ;;  %v3827_v55 = vpack.c.bf16 %v791_v47, %v791_v47  ;;  %v796_v56 = vmax.f32 %v748_v49, 0.0  ;;  %v1160_v7 = vld [vmem:[#allocation2 + $0x18] sm:$0xf] }
 0x18a   : > { %1245 = vst [vmem:[#allocation2 + $0xb0] sm:$0x1] %v1244_v50  ;;  %v740_v57 = vadd.f32 %v5064_v52, %v739_v53  ;;  %1043 = vst [vmem:[#allocation2 + $0x70] sm:$0xf] %v3826_v51  ;;  %v4069_v59 = vpop.f32.mrf.mxu0  ;;  %v1163_v8 = vld [vmem:[#allocation2 + $0x1c] sm:$0x1] }
 0x18b   : > { %v1252_v58 = vld [vmem:[#allocation2 + $0xc8] sm:$0x1]  ;;  %1046 = vst [vmem:[#allocation2 + $0x88] sm:$0xf] %v3829_v54  ;;  %1044 = vst [vmem:[#allocation2 + $0x78] sm:$0xf] %v3827_v55  ;;  %v3832_v61 = vpack.c.bf16 %v796_v56, %v796_v56  ;;  %v751_v63 = vadd.f32 %v4069_v59, %v5064_v52 }
 0x18c   : > { %v1253_v60 = vsel %vm5030_vm2, 0, %v1252_v58  ;;  %v794_v62 = vmax.f32 %v740_v57, 0.0  ;;  %v742_v3 = vpop.f32.mrf.mxu0  ;;  %v1617_v12 = vshrl.u32 %v5143_v1, 16  ;;  %v1620_v13 = vshll.u32 %v5143_v1, 16  ;;  %v1148_v19 = vld [vmem:[#allocation2 + $0x8] sm:$0xf] }
 0x18d   : > { %1254 = vst [vmem:[#allocation2 + $0xc8] sm:$0x1] %v1253_v60  ;;  %v1246_v2 = vld [vmem:[#allocation2 + $0xb8] sm:$0x1]  ;;  %v1084_v5 = vshrl.u32 %v3832_v61, 16  ;;  %v797_v9 = vmax.f32 %v751_v63, 0.0  ;;  %v743_v10 = vadd.f32 %v5064_v52, %v742_v3 }
 0x18e   : > { %v1247_v4 = vsel %vm5030_vm2, 0, %v1246_v2  ;;  %v3830_v6 = vpack.c.bf16 %v794_v62, %v794_v62  ;;  %v4072_v11 = vpop.f32.mrf.mxu0  ;;  %v1087_v15 = vshll.u32 %v3832_v61, 16  ;;  %v1151_v27 = vld [vmem:[#allocation2 + $0xc] sm:$0x1]  ;;  %v1166_v37 = vld [vmem:[#allocation2 + $0x20] sm:$0xf] }
 0x18f   : > { %1248 = vst [vmem:[#allocation2 + $0xb8] sm:$0x1] %v1247_v4  ;;  %v1086_v14 = vrot.slane %v1084_v5, 7  ;;  %v764_v17 = vadd.f32 %v4072_v11, %v5064_v52  ;;  %v3833_v20 = vpack.c.bf16 %v797_v9, %v797_v9  ;;  %v795_v21 = vmax.f32 %v743_v10, 0.0  ;;  %v1169_v46 = vld [vmem:[#allocation2 + $0x24] sm:$0x1] }
 0x190   : > { %v1068_v16 = vshrl.u32 %v3830_v6, 16  ;;  %v1071_v18 = vshll.u32 %v3830_v6, 16  ;;  %v755_v22 = vpop.f32.mrf.mxu0  ;;  %v1154_v55 = vld [vmem:[#allocation2 + $0x10] sm:$0xf]  ;;  %v1157_v56 = vld [vmem:[#allocation2 + $0x14] sm:$0x1] }
 0x191   : > { %v1089_v23 = vor.u32 %v1087_v15, %v1086_v14  ;;  %v1090_v24 = vrot.slane %v1086_v14, 4  ;;  %v800_v26 = vmax.f32 %v764_v17, 0.0  ;;  %v1092_v28 = vshrl.u32 %v3833_v20, 16  ;;  %v1187_v9 = vld [vmem:[#allocation2 + $0x3c] sm:$0x1] }
 0x192   : > { %v1070_v25 = vrot.slane %v1068_v16, 7  ;;  %v1095_v29 = vshll.u32 %v3833_v20, 16  ;;  %v3831_v30 = vpack.c.bf16 %v795_v21, %v795_v21  ;;  %v756_v31 = vadd.f32 %v5064_v52, %v755_v22  ;;  %v4073_v32 = vpop.f32.mrf.mxu0  ;;  %v1172_v10 = vld [vmem:[#allocation2 + $0x28] sm:$0xf]  ;;  %v1175_v21 = vld [vmem:[#allocation2 + $0x2c] sm:$0x1] }
 0x193   : > { %v1161_v33 = vsel %vm5078_vm5, %v1089_v23, %v1160_v7  ;;  %v1164_v34 = vsel %vm5030_vm2, %v1090_v24, %v1163_v8  ;;  %v1094_v38 = vrot.slane %v1092_v28, 7  ;;  %v3836_v41 = vpack.c.bf16 %v800_v26, %v800_v26  ;;  %v1184_v8 = vld [vmem:[#allocation2 + $0x38] sm:$0xf] }
 0x194   : > { %v1073_v35 = vor.u32 %v1071_v18, %v1070_v25  ;;  %v1074_v36 = vrot.slane %v1070_v25, 4  ;;  %1162 = vst [vmem:[#allocation2 + $0x18] sm:$0xf] %v1161_v33  ;;  %1165 = vst [vmem:[#allocation2 + $0x1c] sm:$0x1] %v1164_v34  ;;  %v1076_v39 = vshrl.u32 %v3831_v30, 16  ;;  %v758_v43 = vpop.f32.mrf.mxu0  ;;  %v767_v49 = vadd.f32 %v4073_v32, %v5064_v52 }
 0x195   : > { %v1079_v40 = vshll.u32 %v3831_v30, 16  ;;  %v798_v47 = vmax.f32 %v756_v31, 0.0  ;;  %v1097_v50 = vor.u32 %v1095_v29, %v1094_v38  ;;  %v1098_v51 = vrot.slane %v1094_v38, 4  ;;  %v1190_v31 = vld [vmem:[#allocation2 + $0x40] sm:$0xf] }
 0x196   : > { %v1149_v44 = vsel %vm5078_vm5, %v1073_v35, %v1148_v19  ;;  %v1152_v45 = vsel %vm5030_vm2, %v1074_v36, %v1151_v27  ;;  %v1078_v53 = vrot.slane %v1076_v39, 7  ;;  %v1116_v54 = vshrl.u32 %v3836_v41, 16  ;;  %v1193_v34 = vld [vmem:[#allocation2 + $0x44] sm:$0x1]  ;;  %v1178_v35 = vld [vmem:[#allocation2 + $0x30] sm:$0xf] }
 0x197   : > { %1150 = vst [vmem:[#allocation2 + $0x8] sm:$0xf] %v1149_v44  ;;  %1153 = vst [vmem:[#allocation2 + $0xc] sm:$0x1] %v1152_v45  ;;  %v1119_v57 = vshll.u32 %v3836_v41, 16  ;;  %v3834_v58 = vpack.c.bf16 %v798_v47, %v798_v47  ;;  %v801_v59 = vmax.f32 %v767_v49, 0.0  ;;  %v759_v60 = vadd.f32 %v5064_v52, %v758_v43 }
 0x198   : > { %v1167_v61 = vsel %vm5078_vm5, %v1097_v50, %v1166_v37  ;;  %v1170_v62 = vsel %vm5030_vm2, %v1098_v51, %v1169_v46  ;;  %v1081_v63 = vor.u32 %v1079_v40, %v1078_v53  ;;  %v1082_v2 = vrot.slane %v1078_v53, 4  ;;  %v1181_v36 = vld [vmem:[#allocation2 + $0x34] sm:$0x1]  ;;  %v1598_v41 = vld [vmem:[#allocation2 + $0x4] sm:$0x1] }
 0x199   : > { %1168 = vst [vmem:[#allocation2 + $0x20] sm:$0xf] %v1167_v61  ;;  %1171 = vst [vmem:[#allocation2 + $0x24] sm:$0x1] %v1170_v62  ;;  %v1118_v3 = vrot.slane %v1116_v54, 7  ;;  %v1100_v4 = vshrl.u32 %v3834_v58, 16  ;;  %v3837_v6 = vpack.c.bf16 %v801_v59, %v801_v59 }
 0x19a   : > { %v1103_v5 = vshll.u32 %v3834_v58, 16  ;;  %v1155_v7 = vsel %vm5078_vm5, %v1081_v63, %v1154_v55  ;;  %v1158_v52 = vsel %vm5030_vm2, %v1082_v2, %v1157_v56  ;;  %v799_v11 = vmax.f32 %v759_v60, 0.0 }
 0x19b   : > { %v5172_v14 = vrot.slane %v1617_v12, 4  ;;  %v1213_v15 = vld [vmem:[#allocation2 + $0x18] sm:$0x1]  ;;  %1156 = vst [vmem:[#allocation2 + $0x10] sm:$0xf] %v1155_v7  ;;  %v1121_v16 = vor.u32 %v1119_v57, %v1118_v3  ;;  %v1122_v17 = vrot.slane %v1118_v3, 4 }
 0x19c   : > { %1159 = vst [vmem:[#allocation2 + $0x14] sm:$0x1] %v1158_v52  ;;  %v1102_v18 = vrot.slane %v1100_v4, 7  ;;  %v1124_v19 = vshrl.u32 %v3837_v6, 16  ;;  %v1214_v20 = vsel %vm5030_vm2, 0, %v1213_v15  ;;  %v1127_v22 = vshll.u32 %v3837_v6, 16 }
 0x19d   : > { %v3835_v23 = vpack.c.bf16 %v799_v11, %v799_v11  ;;  %v1622_v24 = vrot.slane %v1620_v13, 5  ;;  %1215 = vst [vmem:[#allocation2 + $0x18] sm:$0x1] %v1214_v20  ;;  %v1185_v12 = vsel %vm5078_vm5, %v1121_v16, %v1184_v8  ;;  %v1188_v26 = vsel %vm5030_vm2, %v1122_v17, %v1187_v9  ;;  %v1604_v55 = vld [vmem:[#allocation2 + $0x1c] sm:$0x1] }
 0x19e   : > { %v1207_v25 = vld [vmem:[#allocation2 + $0x8] sm:$0x1]  ;;  %v1105_v27 = vor.u32 %v1103_v5, %v1102_v18  ;;  %v1106_v28 = vrot.slane %v1102_v18, 4  ;;  %1186 = vst [vmem:[#allocation2 + $0x38] sm:$0xf] %v1185_v12  ;;  %v1126_v30 = vrot.slane %v1124_v19, 7 }
 0x19f   : > { %v1208_v29 = vsel %vm5030_vm2, 0, %v1207_v25  ;;  %1189 = vst [vmem:[#allocation2 + $0x3c] sm:$0x1] %v1188_v26  ;;  %v1108_v32 = vshrl.u32 %v3835_v23, 16  ;;  %v1111_v1 = vshll.u32 %v3835_v23, 16  ;;  %v1623_v45 = vor.u32 %v1622_v24, %v5172_v14 }
 0x1a0   : > { %1209 = vst [vmem:[#allocation2 + $0x8] sm:$0x1] %v1208_v29  ;;  %v1173_v13 = vsel %vm5078_vm5, %v1105_v27, %v1172_v10  ;;  %v1176_v33 = vsel %vm5030_vm2, %v1106_v28, %v1175_v21  ;;  %v1216_v37 = vld [vmem:[#allocation2 + $0x20] sm:$0x1]  ;;  %v1129_v38 = vor.u32 %v1127_v22, %v1126_v30  ;;  %v1130_v39 = vrot.slane %v1126_v30, 4  ;;  %v4488_v10 = vld [vmem:[#allocation8 + $0x70] sm:$0xff]  }
 0x1a1   : > { %1174 = vst [vmem:[#allocation2 + $0x28] sm:$0xf] %v1173_v13  ;;  %1177 = vst [vmem:[#allocation2 + $0x2c] sm:$0x1] %v1176_v33  ;;  %v1110_v40 = vrot.slane %v1108_v32, 7  ;;  %v1217_v43 = vsel %vm5030_vm2, 0, %v1216_v37 }
 0x1a2   : > { %v1600_v44 = vld [vmem:[#allocation2 + $0xc] sm:$0x1]  ;;  %1218 = vst [vmem:[#allocation2 + $0x20] sm:$0x1] %v1217_v43  ;;  %v1210_v46 = vld [vmem:[#allocation2 + $0x10] sm:$0x1]  ;;  %v1191_v47 = vsel %vm5078_vm5, %v1129_v38, %v1190_v31  ;;  %v1194_v49 = vsel %vm5030_vm2, %v1130_v39, %v1193_v34 }
 0x1a3   : > { %v1113_v50 = vor.u32 %v1111_v1, %v1110_v40  ;;  %v1114_v51 = vrot.slane %v1110_v40, 4  ;;  %v1211_v53 = vsel %vm5030_vm2, 0, %v1210_v46  ;;  %1192 = vst [vmem:[#allocation2 + $0x40] sm:$0xf] %v1191_v47  ;;  %1195 = vst [vmem:[#allocation2 + $0x44] sm:$0x1] %v1194_v49 }
 0x1a4   : > { %v1626_v54 = vshll.u32 %v1598_v41, 16  ;;  %1212 = vst [vmem:[#allocation2 + $0x10] sm:$0x1] %v1211_v53  ;;  %v1640_v58 = vshll.u32 %v1600_v44, 16  ;;  %v1603_v59 = vld [vmem:[#allocation2 + $0x18] sm:$0xf] }
 0x1a5   : > { %v1179_v56 = vsel %vm5078_vm5, %v1113_v50, %v1178_v35  ;;  %v1182_v57 = vsel %vm5030_vm2, %v1114_v51, %v1181_v36  ;;  %v1225_v60 = vld [vmem:[#allocation2 + $0x38] sm:$0x1]  ;;  %v1659_v61 = vshrl.u32 %v1603_v59, 16  ;;  %v1662_v62 = vshll.u32 %v1603_v59, 16  ;;  %v1602_v11 = vld [vmem:[#allocation2 + $0x14] sm:$0x1] }
 0x1a6   : > { %1180 = vst [vmem:[#allocation2 + $0x30] sm:$0xf] %v1179_v56  ;;  %1183 = vst [vmem:[#allocation2 + $0x34] sm:$0x1] %v1182_v57  ;;  %v1226_v63 = vsel %vm5030_vm2, 0, %v1225_v60  ;;  %v1624_v3 = vrot.slane %v1623_v45, 4 }
 0x1a7   : > { %v4483_v2 = vld [vmem:[#allocation2] ss:$8 sps:$4 sm:$0xff]   ;;  %1227 = vst [vmem:[#allocation2 + $0x38] sm:$0x1] %v1226_v63  ;;  %v1628_v5 = vrot.slane %v1626_v54, 5  ;;  %v1668_v6 = vshll.u32 %v1604_v55, 16 }
 0x1a8   : > { %v1219_v4 = vld [vmem:[#allocation2 + $0x28] sm:$0x1]  ;;  %4090 = vmatprep.mubr.bf16.mxu1 %v4483_v2  ;;  %v1642_v9 = vrot.slane %v1640_v58, 5  ;;  %v1661_v14 = vrot.slane %v1659_v61, 4  ;;  %v1664_v15 = vrot.slane %v1662_v62, 5  ;;  %v1654_v36 = vshll.u32 %v1602_v11, 16 }
 0x1a9   : > { %v1599_v42 = vld [vmem:[#allocation2 + $0x8] sm:$0xf]  ;;  %v1220_v7 = vsel %vm5030_vm2, 0, %v1219_v4  ;;  %v1605_v16 = vld [vmem:[#allocation2 + $0x20] sm:$0xf]  ;;  %v1670_v25 = vrot.slane %v1668_v6, 5  ;;  %v1629_v35 = vsel %vm5211_vm8, %v1624_v3, %v1628_v5 }
 0x1aa   : > { %v1631_v52 = vshrl.u32 %v1599_v42, 16  ;;  %v1634_v8 = vshll.u32 %v1599_v42, 16  ;;  %1221 = vst [vmem:[#allocation2 + $0x28] sm:$0x1] %v1220_v7  ;;  %v1228_v17 = vld [vmem:[#allocation2 + $0x40] sm:$0x1]  ;;  %v1665_v33 = vor.u32 %v1664_v15, %v1661_v14 }
 0x1ab   : > { %v1608_v20 = vld [vmem:[#allocation2 + $0x2c] sm:$0x1]  ;;  %v1673_v21 = vshrl.u32 %v1605_v16, 16  ;;  %v1676_v22 = vshll.u32 %v1605_v16, 16  ;;  %v1229_v23 = vsel %vm5030_vm2, 0, %v1228_v17  ;;  %v1656_v53 = vrot.slane %v1654_v36, 5 }
 0x1ac   : > { %v1633_v18 = vrot.slane %v1631_v52, 4  ;;  %v1636_v19 = vrot.slane %v1634_v8, 5  ;;  %v4486_v24 = vld [vmem:[#allocation2 + $0x10] ss:$8 sps:$4 sm:$0xff]   ;;  %1230 = vst [vmem:[#allocation2 + $0x40] sm:$0x1] %v1229_v23 }
 0x1ad   : > { %v1222_v12 = vld [vmem:[#allocation2 + $0x30] sm:$0x1]  ;;  %v1675_v28 = vrot.slane %v1673_v21, 4  ;;  %v1678_v29 = vrot.slane %v1676_v22, 5  ;;  %4091 = vmatmul.mubr.bf16.vlgmr.msra.gmra.mxu1 %v4486_v24  ;;  %v4491_v32 = vld [vmem:[#allocation8 + $0x68] sm:$0xff]   ;;  %v1696_v40 = vshll.u32 %v1608_v20, 16 }
 0x1ae   : > { %v1637_v26 = vor.u32 %v1636_v19, %v1633_v18  ;;  %v1601_v27 = vld [vmem:[#allocation2 + $0x10] sm:$0xf]  ;;  %v1223_v30 = vsel %vm5030_vm2, 0, %v1222_v12  ;;  %v1606_v34 = vld [vmem:[#allocation2 + $0x24] sm:$0x1]  ;;  %4099 = vmatpush3.bf16.msra.mxu1 %v5058_v48  ;;  %v1666_v50 = vrot.slane %v1665_v33, 4 }
 0x1af   : > { %v1645_v1 = vshrl.u32 %v1601_v27, 16  ;;  %v1648_v13 = vshll.u32 %v1601_v27, 16  ;;  %1224 = vst [vmem:[#allocation2 + $0x30] sm:$0x1] %v1223_v30  ;;  %v1611_v37 = vld [vmem:[#allocation2 + $0x38] sm:$0xf]  ;;  %4100 = vmatprep.subr.bf16.mxu1 %v4488_v10  ;;  %v1679_v47 = vor.u32 %v1678_v29, %v1675_v28 }
 0x1b0   : > { %v1638_v0 = vrot.slane %v1637_v26, 4  ;;  %v1612_v41 = vld [vmem:[#allocation2 + $0x3c] sm:$0x1]  ;;  %v1715_v43 = vshrl.u32 %v1611_v37, 16  ;;  %v4495_v54 = vld [vmem:[#allocation8 + $0x60] sm:$0xff]   ;;  %v1682_v55 = vshll.u32 %v1606_v34, 16  ;;  %v1671_v52 = vsel %vm5211_vm8, %v1666_v50, %v1670_v25 }
 0x1b1   : > { %v1647_v38 = vrot.slane %v1645_v1, 4  ;;  %v1650_v39 = vrot.slane %v1648_v13, 5  ;;  %v4489_v44 = vld [vmem:[#allocation2 + $0x20] ss:$8 sps:$4 sm:$0xff]   ;;  %v1718_v57 = vshll.u32 %v1611_v37, 16  ;;  %v1698_v60 = vrot.slane %v1696_v40, 5 }
 0x1b2   : > { %v1643_v45 = vsel %vm5211_vm8, %v1638_v0, %v1642_v9  ;;  %v1607_v46 = vld [vmem:[#allocation2 + $0x28] sm:$0xf]  ;;  %4094 = vmatprep.mubr.bf16.mxu1 %v4489_v44  ;;  %4101 = vmatpush3.bf16.msra.mxu1 %v4488_v10  ;;  %v1610_v61 = vld [vmem:[#allocation2 + $0x34] sm:$0x1]  ;;  %v1717_v62 = vrot.slane %v1715_v43, 4  ;;  %v1680_v3 = vrot.slane %v1679_v47, 4 }
 0x1b3   : > { %v3690_v49 = vcombine.low %v1629_v35, %v1643_v45  ;;  %v1651_v48 = vor.u32 %v1650_v39, %v1647_v38  ;;  %v1687_v51 = vshrl.u32 %v1607_v46, 16  ;;  %v1690_v56 = vshll.u32 %v1607_v46, 16  ;;  %4102 = vmatprep.subr.bf16.mxu1 %v4491_v32  ;;  %v4494_v63 = vld [vmem:[#allocation2 + $0x48] ss:$8 sps:$4 sm:$0xff]   ;;  %v4497_v16 = vld [vmem:[#allocation8 + $0x58] sm:$0xff]   ;;  %v4501_v34 = vld [vmem:[#allocation8 + $0x120] sm:$0xff]  }
 0x1b4   : > { %v4496_v2 = vld [vmem:[#allocation8 + $0x130] sm:$0xff]   ;;  %v1720_v42 = vrot.slane %v1718_v57, 5  ;;  %v1724_v5 = vshll.u32 %v1612_v41, 16  ;;  %v1684_v15 = vrot.slane %v1682_v55, 5  ;;  %v1710_v21 = vshll.u32 %v1610_v61, 16  ;;  %v4582_v22 = vld [vmem:[#allocation8 + $0x138] sm:$0xff]  }
 0x1b5   : > { %4138 = vmatprep.mubr.bf16.mxu0 %v3690_v49  ;;  %v1652_v58 = vrot.slane %v1651_v48, 4  ;;  %v1689_v59 = vrot.slane %v1687_v51, 4  ;;  %v1692_v4 = vrot.slane %v1690_v56, 5  ;;  %v4498_v25 = vld [vmem:[#allocation8 + $0x128] sm:$0xff]   ;;  %v4500_v29 = vld [vmem:[#allocation8 + $0x50] sm:$0xff]   ;;  %v4503_v36 = vld [vmem:[#allocation8 + $0x118] sm:$0xff]  }
 0x1b6   : > { %v4492_v6 = vld [vmem:[#allocation2 + $0x30] ss:$8 sps:$4 sm:$0xff]   ;;  %4103 = vmatpush3.bf16.msra.mxu1 %v4491_v32  ;;  %v1721_v17 = vor.u32 %v1720_v42, %v1717_v62  ;;  %v1685_v23 = vsel %vm5211_vm8, %v1680_v3, %v1684_v15  ;;  %v1726_v27 = vrot.slane %v1724_v5, 5  ;;  %v1712_v32 = vrot.slane %v1710_v21, 5  ;;  %v4502_v0 = vld [vmem:[#allocation8 + $0x48] sm:$0xff]   ;;  %v4504_v37 = vld [vmem:[#allocation8 + $0x40] sm:$0xff]  }
 0x1b7   : > { %v1657_v7 = vsel %vm5211_vm8, %v1652_v58, %v1656_v53  ;;  %v1609_v8 = vld [vmem:[#allocation2 + $0x30] sm:$0xf]  ;;  %v1693_v10 = vor.u32 %v1692_v4, %v1689_v59  ;;  %4095 = vmatmul.mubr.bf16.gmra.mxu1 %v4492_v6  ;;  %4104 = vmatprep.subr.bf16.mxu1 %v4495_v54  ;;  %v4499_v35 = vld [vmem:[#allocation2 + $0xd8] ss:$8 sps:$4 sm:$0xff]   ;;  %v4509_v41 = vld [vmem:[#allocation8 + $0x108] sm:$0xff]  }
 0x1b8   : > { %v3691_v9 = vcombine.low %v1657_v7, %v1671_v52  ;;  %v1701_v11 = vshrl.u32 %v1609_v8, 16  ;;  %v1704_v14 = vshll.u32 %v1609_v8, 16  ;;  %4114 = vmatprep.mubr.bf16.mxu1 %v4494_v63  ;;  %v1722_v26 = vrot.slane %v1721_v17, 4  ;;  %v4505_v38 = vld [vmem:[#allocation8 + $0x110] sm:$0xff]   ;;  %v4507_v39 = vld [vmem:[#allocation8 + $0xf8] sm:$0xff]   ;;  %v4511_v45 = vld [vmem:[#allocation8 + $0x100] sm:$0xff]  }
 0x1b9   : > { %v1694_v18 = vrot.slane %v1693_v10, 4  ;;  %v4506_v40 = vld [vmem:[#allocation2 + $0x58] ss:$8 sps:$4 sm:$0xff]   ;;  %v4510_v43 = vld [vmem:[#allocation8 + $0xf0] sm:$0xff]   ;;  %v4513_v46 = vld [vmem:[#allocation8 + $0xe8] sm:$0xff]  }
 0x1ba   : > { %4139 = vmatmul.mubr.bf16.vlgmr.msra.gmra.mxu0 %v3691_v9  ;;  %v1703_v19 = vrot.slane %v1701_v11, 4  ;;  %v1706_v20 = vrot.slane %v1704_v14, 5  ;;  %4105 = vmatpush3.bf16.msra.mxu1 %v4495_v54  ;;  %v1727_v13 = vsel %vm5211_vm8, %v1722_v26, %v1726_v27  ;;  %v4508_v44 = vld [vmem:[#allocation2 + $0x68] ss:$8 sps:$4 sm:$0xff]   ;;  %v4512_v47 = vld [vmem:[#allocation2 + $0x78] ss:$8 sps:$4 sm:$0xff]  }
 0x1bb   : > { %4171 = vmatpush3.bf16.msra.mxu0 %v4582_v22  ;;  %v1699_v24 = vsel %vm5211_vm8, %v1694_v18, %v1698_v60  ;;  %4106 = vmatprep.subr.bf16.mxu1 %v4497_v16  ;;  %v4516_v49 = vld [vmem:[#allocation8 + $0x1b8] sm:$0xff]   ;;  %v4518_v48 = vld [vmem:[#allocation8 + $0xe0] sm:$0xff]   ;;  %v4515_v51 = vld [vmem:[#allocation2 + $0xe8] ss:$8 sps:$4 sm:$0xff]  }
 0x1bc   : > { %4172 = vmatprep.subr.bf16.mxu0 %v4496_v2  ;;  %v1707_v12 = vor.u32 %v1706_v20, %v1703_v19  ;;  %v3692_v28 = vcombine.low %v1685_v23, %v1699_v24  ;;  %v4514_v50 = vld [vmem:[#allocation2 + $0x90] ss:$8 sps:$4 sm:$0xff]   ;;  %v4522_v56 = vld [vmem:[#allocation8 + $0x1a8] sm:$0xff]   ;;  %v4525_v59 = vld [vmem:[#allocation8 + $0x1a0] sm:$0xff]  }
 0x1bd   : > { %v4519_v53 = vld [vmem:[#allocation8 + $0x1b0] sm:$0xff]   ;;  %v4517_v54 = vld [vmem:[#allocation2 + $0xf8] ss:$8 sps:$4 sm:$0xff]   ;;  %v4526_v62 = vld [vmem:[#allocation8 + $0xc8] sm:$0xff]  }
 0x1be   : > { %v1708_v30 = vrot.slane %v1707_v12, 4  ;;  %4142 = vmatprep.mubr.bf16.mxu0 %v3692_v28  ;;  %4107 = vmatpush3.bf16.msra.mxu1 %v4497_v16  ;;  %v4520_v55 = vld [vmem:[#allocation8 + $0xd8] sm:$0xff]   ;;  %v4524_v57 = vld [vmem:[#allocation8 + $0xd0] sm:$0xff]   ;;  %v4528_v42 = vld [vmem:[#allocation8 + $0xc0] sm:$0xff]  }
 0x1bf   : > { %4173 = vmatpush3.bf16.msra.mxu0 %v4496_v2  ;;  %4108 = vmatprep.subr.bf16.mxu1 %v4500_v29  ;;  %v4521_v58 = vld [vmem:[#allocation2 + $0x108] ss:$8 sps:$4 sm:$0xff]   ;;  %v2224_v60 = vld [vmem:[#allocation2 + $0x98] sm:$0xf]  ;;  %v2225_v14 = vld [vmem:[#allocation2 + $0x9c] sm:$0x1] }
 0x1c0   : > { %4174 = vmatprep.subr.bf16.mxu0 %v4498_v25  ;;  %v1713_v1 = vsel %vm5211_vm8, %v1708_v30, %v1712_v32  ;;  %v4523_v61 = vld [vmem:[#allocation2 + $0x8] ss:$8 sps:$4 sm:$0xff]   ;;  %v2253_v2 = vshrl.u32 %v2224_v60, 16  ;;  %v2256_v3 = vshll.u32 %v2224_v60, 16  ;;  %v4527_v4 = vld [vmem:[#allocation8 + $0x198] sm:$0xff]   ;;  %v2262_v22 = vshll.u32 %v2225_v14, 16 }
 0x1c1   : > { %v3693_v33 = vcombine.low %v1713_v1, %v1727_v13  ;;  %v2222_v63 = vld [vmem:[#allocation2 + $0x90] sm:$0xf]  ;;  %v4531_v9 = vld [vmem:[#allocation8 + $0x178] sm:$0xff]   ;;  %v4533_v17 = vld [vmem:[#allocation8 + $0x188] sm:$0xff]  }
 0x1c2   : > { %4109 = vmatpush3.bf16.msra.mxu1 %v4500_v29  ;;  %v2239_v5 = vshrl.u32 %v2222_v63, 16  ;;  %v2242_v6 = vshll.u32 %v2222_v63, 16  ;;  %v2255_v7 = vrot.slane %v2253_v2, 4  ;;  %v2258_v52 = vrot.slane %v2256_v3, 5  ;;  %v4529_v8 = vld [vmem:[#allocation8 + $0x190] sm:$0xff]   ;;  %v4535_v28 = vld [vmem:[#allocation8 + $0x180] sm:$0xff]  }
 0x1c3   : > { %4143 = vmatmul.mubr.bf16.gmra.mxu0 %v3693_v33  ;;  %4110 = vmatprep.subr.bf16.mxu1 %v4502_v0  ;;  %v2846_v16 = vld [vmem:[#allocation2 + $0x10] sm:$0xf]  ;;  %v2223_v18 = vld [vmem:[#allocation2 + $0x94] sm:$0x1]  ;;  %v4530_v19 = vld [vmem:[#allocation2 + $0xa0] ss:$8 sps:$4 sm:$0xff]  }
 0x1c4   : > { %4175 = vmatpush3.bf16.msra.mxu0 %v4498_v25  ;;  %4186 = vmatprep.mubr.bf16.mxu0 %v4499_v35  ;;  %v2241_v10 = vrot.slane %v2239_v5, 4  ;;  %v2244_v11 = vrot.slane %v2242_v6, 5  ;;  %v2259_v15 = vor.u32 %v2258_v52, %v2255_v7  ;;  %v4534_v20 = vld [vmem:[#allocation8 + $0x170] sm:$0xff]   ;;  %v2844_v23 = vld [vmem:[#allocation2 + $0x8] sm:$0xf]  ;;  %v2875_v25 = vshrl.u32 %v2846_v16, 16 }
 0x1c5   : > { %4176 = vmatprep.subr.bf16.mxu0 %v4501_v34  ;;  %v4532_v24 = vld [vmem:[#allocation2 + $0xb0] ss:$8 sps:$4 sm:$0xff]   ;;  %v2878_v12 = vshll.u32 %v2846_v16, 16  ;;  %v2248_v26 = vshll.u32 %v2223_v18, 16  ;;  %v2861_v29 = vshrl.u32 %v2844_v23, 16  ;;  %v2864_v30 = vshll.u32 %v2844_v23, 16 }
 0x1c6   : > { %4111 = vmatpush3.bf16.msra.mxu1 %v4502_v0  ;;  %v2245_v21 = vor.u32 %v2244_v11, %v2241_v10  ;;  %v2260_v27 = vrot.slane %v2259_v15, 4  ;;  %v4537_v32 = vld [vmem:[#allocation8 + $0x168] sm:$0xff]   ;;  %v2264_v13 = vrot.slane %v2262_v22, 5  ;;  %v2226_v33 = vld [vmem:[#allocation2 + $0xa0] sm:$0xf] }
 0x1c7   : > { %4112 = vmatprep.subr.bf16.mxu1 %v4504_v37  ;;  %v2880_v35 = vrot.slane %v2878_v12, 5  ;;  %v2228_v0 = vld [vmem:[#allocation2 + $0xa8] sm:$0xf]  ;;  %v2227_v7 = vld [vmem:[#allocation2 + $0xa4] sm:$0x1] }
 0x1c8   : > { %4177 = vmatpush3.bf16.msra.mxu0 %v4501_v34  ;;  %v2246_v1 = vrot.slane %v2245_v21, 4  ;;  %v2877_v34 = vrot.slane %v2875_v25, 4  ;;  %v4540_v63 = vld [vmem:[#allocation2 + $0x28] ss:$8 sps:$4 sm:$0xff]   ;;  %v2229_v52 = vld [vmem:[#allocation2 + $0xac] sm:$0x1] }
 0x1c9   : > { %4178 = vmatprep.subr.bf16.mxu0 %v4503_v36  ;;  %v4545_v10 = vld [vmem:[#allocation8 + $0x228] sm:$0xff]   ;;  %v2276_v23 = vshll.u32 %v2227_v7, 16  ;;  %v4551_v7 = vld [vmem:[#allocation8 + $0x210] sm:$0xff]  }
 0x1ca   : > { %4113 = vmatpush3.bf16.msra.mxu1 %v4504_v37  ;;  %v2265_v37 = vsel %vm5211_vm8, %v2260_v27, %v2264_v13  ;;  %v2236_v16 = vld [vmem:[#allocation2 + $0xc8] sm:$0xf]  ;;  %v2235_v13 = vld [vmem:[#allocation2 + $0xc4] sm:$0x1] }
 0x1cb   : > { %4146 = vmatprep.subr.bf16.mxu1 %v4507_v39  ;;  %v2337_v27 = vshrl.u32 %v2236_v16, 16  ;;  %v4565_v31 = vld [vmem:[#allocation2 + $0x80] ss:$8 sps:$4 sm:$0xff]  }
 0x1cc   : > { %4179 = vmatpush3.bf16.msra.mxu0 %v4503_v36  ;;  %v2250_v36 = vrot.slane %v2248_v26, 5  ;;  %v2234_v26 = vld [vmem:[#allocation2 + $0xc0] sm:$0xf] }
 0x1cd   : > { %4180 = vmatprep.subr.bf16.mxu0 %v4505_v38  ;;  %4115 = vmatmul.mubr.bf16.vlgmr.msra.gmra.mxu1 %v4506_v40  ;;  %v2863_v40 = vrot.slane %v2861_v29, 4  ;;  %v4544_v29 = vld [vmem:[#allocation2 + $0x38] ss:$8 sps:$4 sm:$0xff]  }
 0x1ce   : > { %4118 = vmatprep.mubr.bf16.mxu1 %v4508_v44  ;;  %4147 = vmatpush3.bf16.msra.mxu1 %v4507_v39  ;;  %v4541_v39 = vld [vmem:[#allocation8 + $0x160] sm:$0xff]   ;;  %v2270_v44 = vshll.u32 %v2226_v33, 16 }
 0x1cf   : > { %4148 = vmatprep.subr.bf16.mxu1 %v4510_v43 }
 0x1d0   : > { %4181 = vmatpush3.bf16.msra.mxu0 %v4505_v38  ;;  %v4539_v38 = vld [vmem:[#allocation8 + $0x238] sm:$0xff]  }
 0x1d1   : > { %4182 = vmatprep.subr.bf16.mxu0 %v4509_v41 }
 0x1d2   : > { %4149 = vmatpush3.bf16.msra.mxu1 %v4510_v43  ;;  %v2267_v43 = vshrl.u32 %v2226_v33, 16 }
 0x1d3   : > { %4150 = vmatprep.subr.bf16.mxu1 %v4513_v46 }
 0x1d4   : > { %4183 = vmatpush3.bf16.msra.mxu0 %v4509_v41  ;;  %v2866_v41 = vrot.slane %v2864_v30, 5 }
 0x1d5   : > { %4184 = vmatprep.subr.bf16.mxu0 %v4511_v45  ;;  %4119 = vmatmul.mubr.bf16.gmra.mxu1 %v4512_v47  ;;  %v2847_v47 = vld [vmem:[#allocation2 + $0x14] sm:$0x1] }
 0x1d6   : > { %4151 = vmatpush3.bf16.msra.mxu1 %v4513_v46  ;;  %4162 = vmatprep.mubr.bf16.mxu1 %v4514_v50  ;;  %v2251_v46 = vsel %vm5211_vm8, %v2246_v1, %v2250_v36  ;;  %v2884_v60 = vshll.u32 %v2847_v47, 16  ;;  %v2854_v47 = vld [vmem:[#allocation2 + $0x30] sm:$0xf] }
 0x1d7   : > { %4152 = vmatprep.subr.bf16.mxu1 %v4518_v48  ;;  %v3726_v50 = vcombine.low %v2251_v46, %v2265_v37  ;;  %v2850_v37 = vld [vmem:[#allocation2 + $0x20] sm:$0xf] }
 0x1d8   : > { %4185 = vmatpush3.bf16.msra.mxu0 %v4511_v45  ;;  %v4536_v45 = vld [vmem:[#allocation2 + $0xc0] ss:$8 sps:$4 sm:$0xff]   ;;  %v2886_v14 = vrot.slane %v2884_v60, 5 }
 0x1d9   : > { %4218 = vmatprep.subr.bf16.mxu0 %v4516_v49  ;;  %v2852_v60 = vld [vmem:[#allocation2 + $0x28] sm:$0xf] }
 0x1da   : > { %4153 = vmatpush3.bf16.msra.mxu1 %v4518_v48  ;;  %v2284_v48 = vshll.u32 %v2228_v0, 16 }
 0x1db   : > { %4187 = vmatmul.mubr.bf16.vlgmr.msra.gmra.mxu0 %v4515_v51  ;;  %4154 = vmatprep.subr.bf16.mxu1 %v4520_v55  ;;  %v2881_v51 = vor.u32 %v2880_v35, %v2877_v34  ;;  %v4548_v34 = vld [vmem:[#allocation8 + $0x148] sm:$0xff]  }
 0x1dc   : > { %4190 = vmatprep.mubr.bf16.mxu0 %v4517_v54  ;;  %4219 = vmatpush3.bf16.msra.mxu0 %v4516_v49  ;;  %v2281_v49 = vshrl.u32 %v2228_v0, 16  ;;  %v4542_v54 = vld [vmem:[#allocation8 + $0x230] sm:$0xff]   ;;  %v2286_v3 = vrot.slane %v2284_v48, 5 }
 0x1dd   : > { %4220 = vmatprep.subr.bf16.mxu0 %v4519_v53  ;;  %v2882_v6 = vrot.slane %v2881_v51, 4  ;;  %v2231_v0 = vld [vmem:[#allocation2 + $0xb4] sm:$0x1]  ;;  %v2848_v51 = vld [vmem:[#allocation2 + $0x18] sm:$0xf] }
 0x1de   : > { %4155 = vmatpush3.bf16.msra.mxu1 %v4520_v55  ;;  %v2845_v55 = vld [vmem:[#allocation2 + $0xc] sm:$0x1]  ;;  %v2283_v2 = vrot.slane %v2281_v49, 4  ;;  %v4549_v49 = vld [vmem:[#allocation8 + $0x218] sm:$0xff]  }
 0x1df   : > { %4156 = vmatprep.subr.bf16.mxu1 %v4524_v57  ;;  %v2870_v5 = vshll.u32 %v2845_v55, 16  ;;  %v2887_v22 = vsel %vm5211_vm8, %v2882_v6, %v2886_v14  ;;  %v4550_v55 = vld [vmem:[#allocation8 + $0x140] sm:$0xff]   ;;  %v2892_v6 = vshll.u32 %v2848_v51, 16  ;;  %v4552_v14 = vld [vmem:[#allocation8 + $0x1f8] sm:$0xff]  }
 0x1e0   : > { %4221 = vmatpush3.bf16.msra.mxu0 %v4519_v53  ;;  %v2230_v53 = vld [vmem:[#allocation2 + $0xb0] sm:$0xf]  ;;  %v2287_v18 = vor.u32 %v2286_v3, %v2283_v2  ;;  %v2934_v2 = vshll.u32 %v2854_v47, 16 }
 0x1e1   : > { %4222 = vmatprep.subr.bf16.mxu0 %v4522_v56  ;;  %v2872_v21 = vrot.slane %v2870_v5, 5  ;;  %v2889_v5 = vshrl.u32 %v2848_v51, 16 }
 0x1e2   : > { %4157 = vmatpush3.bf16.msra.mxu1 %v4524_v57  ;;  %v4538_v57 = vld [vmem:[#allocation2 + $0x18] ss:$8 sps:$4 sm:$0xff]   ;;  %v2288_v35 = vrot.slane %v2287_v18, 4 }
 0x1e3   : > { %4191 = vmatmul.mubr.bf16.gmra.mxu0 %v4521_v58  ;;  %4158 = vmatprep.subr.bf16.mxu1 %v4526_v62  ;;  %v4543_v58 = vld [vmem:[#allocation8 + $0x158] sm:$0xff]  }
 0x1e4   : > { %4223 = vmatpush3.bf16.msra.mxu0 %v4522_v56  ;;  %4234 = vmatprep.mubr.bf16.mxu0 %v4523_v61  ;;  %v2232_v56 = vld [vmem:[#allocation2 + $0xb8] sm:$0xf]  ;;  %v2269_v61 = vrot.slane %v2267_v43, 4 }
 0x1e5   : > { %4224 = vmatprep.subr.bf16.mxu0 %v4525_v59  ;;  %v2856_v18 = vld [vmem:[#allocation2 + $0x38] sm:$0xf] }
 0x1e6   : > { %4159 = vmatpush3.bf16.msra.mxu1 %v4526_v62  ;;  %v2272_v62 = vrot.slane %v2270_v44, 5 }
 0x1e7   : > { %4160 = vmatprep.subr.bf16.mxu1 %v4528_v42 }
 0x1e8   : > { %4225 = vmatpush3.bf16.msra.mxu0 %v4525_v59  ;;  %v2867_v59 = vor.u32 %v2866_v41, %v2863_v40  ;;  %v2273_v15 = vor.u32 %v2272_v62, %v2269_v61  ;;  %v2323_v40 = vshrl.u32 %v2234_v26, 16  ;;  %v2326_v41 = vshll.u32 %v2234_v26, 16  ;;  %v2849_v26 = vld [vmem:[#allocation2 + $0x1c] sm:$0x1] }
 0x1e9   : > { %4226 = vmatprep.subr.bf16.mxu0 %v4527_v4 }
 0x1ea   : > { %4161 = vmatpush3.bf16.msra.mxu1 %v4528_v42  ;;  %v2298_v42 = vshll.u32 %v2230_v53, 16  ;;  %v2868_v11 = vrot.slane %v2867_v59, 4  ;;  %v2274_v1 = vrot.slane %v2273_v15, 4  ;;  %v2332_v59 = vshll.u32 %v2235_v13, 16  ;;  %v2853_v13 = vld [vmem:[#allocation2 + $0x2c] sm:$0x1] }
 0x1eb   : > { %4194 = vmatprep.subr.bf16.mxu1 %v4531_v9  ;;  %v2325_v61 = vrot.slane %v2323_v40, 4  ;;  %v2328_v62 = vrot.slane %v2326_v41, 5 }
 0x1ec   : > { %4227 = vmatpush3.bf16.msra.mxu0 %v4527_v4  ;;  %v2295_v4 = vshrl.u32 %v2230_v53, 16  ;;  %v2873_v30 = vsel %vm5211_vm8, %v2868_v11, %v2872_v21  ;;  %v2903_v53 = vshrl.u32 %v2850_v37, 16 }
 0x1ed   : > { %4228 = vmatprep.subr.bf16.mxu0 %v4529_v8  ;;  %4163 = vmatmul.mubr.bf16.vlgmr.msra.gmra.mxu1 %v4530_v19  ;;  %v3762_v33 = vcombine.low %v2873_v30, %v2887_v22  ;;  %v2936_v22 = vrot.slane %v2934_v2, 5  ;;  %v4554_v30 = vld [vmem:[#allocation8 + $0x1f0] sm:$0xff]  }
 0x1ee   : > { %4166 = vmatprep.mubr.bf16.mxu1 %v4532_v24  ;;  %4195 = vmatpush3.bf16.msra.mxu1 %v4531_v9  ;;  %v2312_v9 = vshll.u32 %v2232_v56, 16  ;;  %v2297_v19 = vrot.slane %v2295_v4, 4  ;;  %v2290_v24 = vshll.u32 %v2229_v52, 16  ;;  %v2237_v4 = vld [vmem:[#allocation2 + $0xcc] sm:$0x1]  ;;  %v2905_v52 = vrot.slane %v2903_v53, 4 }
 0x1ef   : > { %4196 = vmatprep.subr.bf16.mxu1 %v4534_v20 }
 0x1f0   : > { %4229 = vmatpush3.bf16.msra.mxu0 %v4529_v8  ;;  %v2309_v8 = vshrl.u32 %v2232_v56, 16  ;;  %v2314_v12 = vrot.slane %v2312_v9, 5  ;;  %v2292_v43 = vrot.slane %v2290_v24, 5  ;;  %v2917_v9 = vshrl.u32 %v2852_v60, 16 }
 0x1f1   : > { %4230 = vmatprep.subr.bf16.mxu0 %v4533_v17 }
 0x1f2   : > { %4197 = vmatpush3.bf16.msra.mxu1 %v4534_v20  ;;  %v2300_v20 = vrot.slane %v2298_v42, 5  ;;  %v2311_v25 = vrot.slane %v2309_v8, 4  ;;  %v2293_v56 = vsel %vm5211_vm8, %v2288_v35, %v2292_v43  ;;  %v2855_v35 = vld [vmem:[#allocation2 + $0x34] sm:$0x1] }
 0x1f3   : > { %4198 = vmatprep.subr.bf16.mxu1 %v4537_v32 }
 0x1f4   : > { %4231 = vmatpush3.bf16.msra.mxu0 %v4533_v17  ;;  %v4546_v17 = vld [vmem:[#allocation8 + $0x150] sm:$0xff]   ;;  %v2301_v36 = vor.u32 %v2300_v20, %v2297_v19  ;;  %v2315_v44 = vor.u32 %v2314_v12, %v2311_v25  ;;  %v2329_v19 = vor.u32 %v2328_v62, %v2325_v61  ;;  %v2346_v20 = vshll.u32 %v2237_v4, 16  ;;  %v4553_v12 = vld [vmem:[#allocation8 + $0x208] sm:$0xff]   ;;  %v2859_v62 = vld [vmem:[#allocation2 + $0x44] sm:$0x1] }
 0x1f5   : > { %4232 = vmatprep.subr.bf16.mxu0 %v4535_v28  ;;  %4167 = vmatmul.mubr.bf16.gmra.mxu1 %v4536_v45  ;;  %v2339_v45 = vrot.slane %v2337_v27, 4  ;;  %v2851_v27 = vld [vmem:[#allocation2 + $0x24] sm:$0x1] }
 0x1f6   : > { %4199 = vmatpush3.bf16.msra.mxu1 %v4537_v32  ;;  %4210 = vmatprep.mubr.bf16.mxu1 %v3726_v50  ;;  %v4547_v32 = vld [vmem:[#allocation8 + $0x220] sm:$0xff]   ;;  %v2304_v50 = vshll.u32 %v2231_v0, 16  ;;  %v2316_v3 = vrot.slane %v2315_v44, 4  ;;  %v2945_v0 = vshrl.u32 %v2856_v18, 16  ;;  %v2330_v40 = vrot.slane %v2329_v19, 4 }
 0x1f7   : > { %4200 = vmatprep.subr.bf16.mxu1 %v4541_v39  ;;  %v2348_v41 = vrot.slane %v2346_v20, 5 }
 0x1f8   : > { %4233 = vmatpush3.bf16.msra.mxu0 %v4535_v28  ;;  %v2340_v28 = vshll.u32 %v2236_v16, 16  ;;  %v2306_v15 = vrot.slane %v2304_v50, 5  ;;  %v4556_v50 = vld [vmem:[#allocation8 + $0x1e8] sm:$0xff]  }
 0x1f9   : > { %4266 = vmatprep.subr.bf16.mxu0 %v4539_v38 }
 0x1fa   : > { %4201 = vmatpush3.bf16.msra.mxu1 %v4541_v39  ;;  %v2233_v39 = vld [vmem:[#allocation2 + $0xbc] sm:$0x1]  ;;  %v2342_v46 = vrot.slane %v2340_v28, 5  ;;  %v2891_v28 = vrot.slane %v2889_v5, 4 }
 0x1fb   : > { %4235 = vmatmul.mubr.bf16.vlgmr.msra.gmra.mxu0 %v4538_v57  ;;  %4202 = vmatprep.subr.bf16.mxu1 %v4543_v58  ;;  %v2302_v57 = vrot.slane %v2301_v36, 4  ;;  %v2948_v36 = vshll.u32 %v2856_v18, 16 }
 0x1fc   : > { %4238 = vmatprep.mubr.bf16.mxu0 %v4540_v63  ;;  %4267 = vmatpush3.bf16.msra.mxu0 %v4539_v38  ;;  %v2278_v38 = vrot.slane %v2276_v23, 5  ;;  %v2931_v63 = vshrl.u32 %v2854_v47, 16  ;;  %v2343_v42 = vor.u32 %v2342_v46, %v2339_v45  ;;  %v2858_v23 = vld [vmem:[#allocation2 + $0x40] sm:$0xf]  ;;  %v2898_v45 = vshll.u32 %v2849_v26, 16  ;;  %v4560_v26 = vld [vmem:[#allocation8 + $0x1d0] sm:$0xff]  }
 0x1fd   : > { %4268 = vmatprep.subr.bf16.mxu0 %v4542_v54  ;;  %v2307_v24 = vsel %vm5211_vm8, %v2302_v57, %v2306_v15  ;;  %v2912_v46 = vshll.u32 %v2851_v27, 16  ;;  %v2926_v47 = vshll.u32 %v2853_v13, 16  ;;  %v2950_v57 = vrot.slane %v2948_v36, 5  ;;  %v4566_v13 = vld [vmem:[#allocation9 + $0x38] sm:$0xff]   ;;  %v5273_v36 = vld [vmem:[#allocation11 + $0x28] sm:$0xff]  }
 0x1fe   : > { %4203 = vmatpush3.bf16.msra.mxu1 %v4543_v58  ;;  %v2279_v48 = vsel %vm5211_vm8, %v2274_v1, %v2278_v38  ;;  %v2318_v58 = vshll.u32 %v2233_v39, 16  ;;  %v2933_v21 = vrot.slane %v2931_v63, 4  ;;  %v2962_v38 = vshll.u32 %v2858_v23, 16  ;;  %5510 = vst [vmem:[#allocation19_spill] sm:$0xff] %v5273_v36 }
 0x1ff   : > { %4204 = vmatprep.subr.bf16.mxu1 %v4546_v17  ;;  %v3727_v11 = vcombine.low %v2279_v48, %v2293_v56  ;;  %v2947_v56 = vrot.slane %v2945_v0, 4  ;;  %v2914_v4 = vrot.slane %v2912_v46, 5  ;;  %v2928_v5 = vrot.slane %v2926_v47, 5  ;;  %v4570_v0 = vld [vmem:[#allocation9 + $0x28] sm:$0xff]  }
 0x200   : > { %4269 = vmatpush3.bf16.msra.mxu0 %v4542_v54  ;;  %v2906_v54 = vshll.u32 %v2850_v37, 16  ;;  %v2320_v16 = vrot.slane %v2318_v58, 5  ;;  %v2959_v37 = vshrl.u32 %v2858_v23, 16  ;;  %v2937_v43 = vor.u32 %v2936_v22, %v2933_v21  ;;  %v4559_v21 = vld [vmem:[#allocation8 + $0x1d8] sm:$0xff]   ;;  %v5292_v47 = vld [vmem:[#allocation11 + $0x8] sm:$0xff]  }
 0x201   : > { %4270 = vmatprep.subr.bf16.mxu0 %v4545_v10  ;;  %5514 = vst [vmem:[#allocation23_spill] sm:$0xff] %v5292_v47 }
 0x202   : > { %4205 = vmatpush3.bf16.msra.mxu1 %v4546_v17  ;;  %v2908_v8 = vrot.slane %v2906_v54, 5  ;;  %v2334_v17 = vrot.slane %v2332_v59, 5  ;;  %v2321_v25 = vsel %vm5211_vm8, %v2316_v3, %v2320_v16  ;;  %v2940_v54 = vshll.u32 %v2855_v35, 16  ;;  %v5269_v35 = vld [vmem:[#allocation11 + $0x30] sm:$0xff]  }
 0x203   : > { %4239 = vmatmul.mubr.bf16.gmra.mxu0 %v4544_v29  ;;  %4206 = vmatprep.subr.bf16.mxu1 %v4548_v34  ;;  %v2894_v29 = vrot.slane %v2892_v6, 5  ;;  %v3728_v39 = vcombine.low %v2307_v24, %v2321_v25  ;;  %v2961_v58 = vrot.slane %v2959_v37, 4  ;;  %v2964_v59 = vrot.slane %v2962_v38, 5  ;;  %5509 = vst [vmem:[#allocation18_spill] sm:$0xff] %v5269_v35  ;;  %v4572_v37 = vld [vmem:[#allocation9 + $0x20] sm:$0xff]  }
 0x204   : > { %4271 = vmatpush3.bf16.msra.mxu0 %v4545_v10  ;;  %4282 = vmatprep.mubr.bf16.mxu0 %v3762_v33  ;;  %v2920_v10 = vshll.u32 %v2852_v60, 16  ;;  %v2909_v1 = vor.u32 %v2908_v8, %v2905_v52  ;;  %v2919_v33 = vrot.slane %v2917_v9, 4  ;;  %v2335_v60 = vsel %vm5211_vm8, %v2330_v40, %v2334_v17  ;;  %v4558_v8 = vld [vmem:[#allocation8 + $0x1e0] sm:$0xff]   ;;  %v5281_v40 = vld [vmem:[#allocation11 + $0x18] sm:$0xff]  }
 0x205   : > { %4272 = vmatprep.subr.bf16.mxu0 %v4547_v32  ;;  %v2895_v44 = vor.u32 %v2894_v29, %v2891_v28  ;;  %v2938_v61 = vrot.slane %v2937_v43, 4  ;;  %v2900_v3 = vrot.slane %v2898_v45, 5  ;;  %v2942_v6 = vrot.slane %v2940_v54, 5  ;;  %v4561_v28 = vld [vmem:[#allocation8 + $0x1c8] sm:$0xff]   ;;  %v4583_v29 = vld [vmem:[%s5016_s24] sm:$0xff]   ;;  %5512 = vst [vmem:[#allocation21_spill] sm:$0xff] %v5281_v40 }
 0x206   : > { %4207 = vmatpush3.bf16.msra.mxu1 %v4548_v34  ;;  %v2922_v34 = vrot.slane %v2920_v10, 5  ;;  %v2910_v51 = vrot.slane %v2909_v1, 4  ;;  %v2951_v9 = vor.u32 %v2950_v57, %v2947_v56  ;;  %v2965_v10 = vor.u32 %v2964_v59, %v2961_v58  ;;  %v4564_v1 = vld [vmem:[#allocation2 + $0x70] ss:$8 sps:$4 sm:$0xff]   ;;  %v5275_v38 = vld [vmem:[#allocation11 + $0x20] sm:$0xff]   ;;  %v4578_v45 = vld [vmem:[#allocation9 + $0x8] sm:$0xff]  }
 0x207   : > { %4208 = vmatprep.subr.bf16.mxu1 %v4550_v55  ;;  %v2896_v2 = vrot.slane %v2895_v44, 4  ;;  %v2943_v15 = vsel %vm5211_vm8, %v2938_v61, %v2942_v6  ;;  %5511 = vst [vmem:[#allocation20_spill] sm:$0xff] %v5275_v38  ;;  %v5287_v44 = vld [vmem:[#allocation11 + $0x10] sm:$0xff]   ;;  %v4584_v54 = vld [vmem:[%s5016_s24 + $0x8] sm:$0xff]  }
 0x208   : > { %4273 = vmatpush3.bf16.msra.mxu0 %v4547_v32  ;;  %v2344_v32 = vrot.slane %v2343_v42, 4  ;;  %v2923_v53 = vor.u32 %v2922_v34, %v2919_v33  ;;  %v2915_v52 = vsel %vm5211_vm8, %v2910_v51, %v2914_v4  ;;  %v2952_v22 = vrot.slane %v2951_v9, 4  ;;  %v5265_v33 = vld [vmem:[#allocation11 + $0x38] sm:$0xff]   ;;  %v4568_v34 = vld [vmem:[#allocation9 + $0x30] sm:$0xff]   ;;  %5513 = vst [vmem:[#allocation22_spill] sm:$0xff] %v5287_v44 }
 0x209   : > { %4274 = vmatprep.subr.bf16.mxu0 %v4549_v49  ;;  %v2901_v16 = vsel %vm5211_vm8, %v2896_v2, %v2900_v3  ;;  %v2966_v23 = vrot.slane %v2965_v10, 4  ;;  %5508 = vst [vmem:[#allocation17_spill] sm:$0xff] %v5265_v33 }
 0x20a   : > { %4209 = vmatpush3.bf16.msra.mxu1 %v4550_v55  ;;  %v2349_v48 = vsel %vm5211_vm8, %v2344_v32, %v2348_v41  ;;  %v2857_v55 = vld [vmem:[#allocation2 + $0x3c] sm:$0x1]  ;;  %v2924_v42 = vrot.slane %v2923_v53, 4  ;;  %v3763_v17 = vcombine.low %v2901_v16, %v2915_v52  ;;  %v4563_v32 = vld [vmem:[#allocation2 + $0x60] ss:$8 sps:$4 sm:$0xff]   ;;  %v4576_v41 = vld [vmem:[#allocation9 + $0x10] sm:$0xff]  }
 0x20b   : > { %4242 = vmatprep.subr.bf16.mxu1 %v4552_v14  ;;  %v3729_v63 = vcombine.low %v2335_v60, %v2349_v48 }
 0x20c   : > { %4275 = vmatpush3.bf16.msra.mxu0 %v4549_v49  ;;  %v4555_v49 = vld [vmem:[#allocation8 + $0x200] sm:$0xff]   ;;  %v2929_v18 = vsel %vm5211_vm8, %v2924_v42, %v2928_v5 }
 0x20d   : > { %4276 = vmatprep.subr.bf16.mxu0 %v4551_v7  ;;  %4211 = vmatmul.mubr.bf16.vlgmr.msra.gmra.mxu1 %v3727_v11  ;;  %v2968_v11 = vshll.u32 %v2859_v62, 16  ;;  %v3764_v20 = vcombine.low %v2929_v18, %v2943_v15 }
 0x20e   : > { %4214 = vmatprep.mubr.bf16.mxu1 %v3728_v39  ;;  %4243 = vmatpush3.bf16.msra.mxu1 %v4552_v14  ;;  %v4557_v14 = vld [vmem:[#allocation2 + $0x50] ss:$8 sps:$4 sm:$0xff]  }
 0x20f   : > { %4244 = vmatprep.subr.bf16.mxu1 %v4554_v30  ;;  %v2970_v24 = vrot.slane %v2968_v11, 5  ;;  %v4574_v39 = vld [vmem:[#allocation9 + $0x18] sm:$0xff]  }
 0x210   : > { %4277 = vmatpush3.bf16.msra.mxu0 %v4551_v7  ;;  %v2954_v7 = vshll.u32 %v2857_v55, 16 }
 0x211   : > { %4278 = vmatprep.subr.bf16.mxu0 %v4553_v12 }
 0x212   : > { %4245 = vmatpush3.bf16.msra.mxu1 %v4554_v30  ;;  %v2956_v19 = vrot.slane %v2954_v7, 5  ;;  %v4562_v30 = vld [vmem:[#allocation8 + $0x1c0] sm:$0xff]  }
 0x213   : > { %4246 = vmatprep.subr.bf16.mxu1 %v4556_v50 }
 0x214   : > { %4279 = vmatpush3.bf16.msra.mxu0 %v4553_v12  ;;  %v2957_v25 = vsel %vm5211_vm8, %v2952_v22, %v2956_v19  ;;  %v2971_v12 = vsel %vm5211_vm8, %v2966_v23, %v2970_v24 }
 0x215   : > { %4280 = vmatprep.subr.bf16.mxu0 %v4555_v49  ;;  %4215 = vmatmul.mubr.bf16.gmra.mxu1 %v3729_v63  ;;  %v3765_v27 = vcombine.low %v2957_v25, %v2971_v12 }
 0x216   : > { %4247 = vmatpush3.bf16.msra.mxu1 %v4556_v50  ;;  %4258 = vmatprep.mubr.bf16.mxu1 %v4557_v14  ;;  %v5296_v50 = vld [vmem:[#allocation11] sm:$0xff]  }
 0x217   : > { %4248 = vmatprep.subr.bf16.mxu1 %v4558_v8  ;;  %5515 = vst [vmem:[#allocation24_spill] sm:$0xff] %v5296_v50 }
 0x218   : > { %4281 = vmatpush3.bf16.msra.mxu0 %v4555_v49  ;;  %v4580_v49 = vld [vmem:[#allocation9] sm:$0xff]  }
 0x219   : > { %4314 = vmatprep.subr.bf16.mxu0 %v5265_v33 }
 0x21a   : > { %4249 = vmatpush3.bf16.msra.mxu1 %v4558_v8 }
 0x21b   : > { %4283 = vmatmul.mubr.bf16.vlgmr.msra.gmra.mxu0 %v3763_v17  ;;  %4250 = vmatprep.subr.bf16.mxu1 %v4559_v21 }
 0x21c   : > { %4286 = vmatprep.mubr.bf16.mxu0 %v3764_v20  ;;  %4315 = vmatpush3.bf16.msra.mxu0 %v5265_v33 }
 0x21d   : > { %4316 = vmatprep.subr.bf16.mxu0 %v5269_v35 }
 0x21e   : > { %4251 = vmatpush3.bf16.msra.mxu1 %v4559_v21 }
 0x21f   : > { %4252 = vmatprep.subr.bf16.mxu1 %v4560_v26 }
 0x220   : > { %4317 = vmatpush3.bf16.msra.mxu0 %v5269_v35 }
 0x221   : > { %4318 = vmatprep.subr.bf16.mxu0 %v5273_v36 }
 0x222   : > { %4253 = vmatpush3.bf16.msra.mxu1 %v4560_v26 }
 0x223   : > { %4287 = vmatmul.mubr.bf16.gmra.mxu0 %v3765_v27  ;;  %4254 = vmatprep.subr.bf16.mxu1 %v4561_v28 }
 0x224   : > { %4330 = vmatprep.mubr.bf16.mxu0 %v4583_v29  ;;  %4319 = vmatpush3.bf16.msra.mxu0 %v5273_v36 }
 0x225   : > { %4320 = vmatprep.subr.bf16.mxu0 %v5275_v38 }
 0x226   : > { %4255 = vmatpush3.bf16.msra.mxu1 %v4561_v28 }
 0x227   : > { %4256 = vmatprep.subr.bf16.mxu1 %v4562_v30 }
 0x228   : > { %4321 = vmatpush3.bf16.msra.mxu0 %v5275_v38 }
 0x229   : > { %4322 = vmatprep.subr.bf16.mxu0 %v5281_v40 }
 0x22a   : > { %4257 = vmatpush3.bf16.msra.mxu1 %v4562_v30 }
 0x22b   : > { %4290 = vmatprep.subr.bf16.mxu1 %v4566_v13 }
 0x22c   : > { %4323 = vmatpush3.bf16.msra.mxu0 %v5281_v40 }
 0x22d   : > { %4259 = vmatmul.mubr.bf16.vlgmr.msra.gmra.mxu1 %v4563_v32  ;;  %4324 = vmatprep.subr.bf16.mxu0 %v5287_v44 }
 0x22e   : > { %4262 = vmatprep.mubr.bf16.mxu1 %v4564_v1  ;;  %4291 = vmatpush3.bf16.msra.mxu1 %v4566_v13 }
 0x22f   : > { %4292 = vmatprep.subr.bf16.mxu1 %v4568_v34 }
 0x230   : > { %4325 = vmatpush3.bf16.msra.mxu0 %v5287_v44 }
 0x231   : > { %4326 = vmatprep.subr.bf16.mxu0 %v5292_v47 }
 0x232   : > { %4293 = vmatpush3.bf16.msra.mxu1 %v4568_v34 }
 0x233   : > { %4294 = vmatprep.subr.bf16.mxu1 %v4570_v0 }
 0x234   : > { %4327 = vmatpush3.bf16.msra.mxu0 %v5292_v47 }
 0x235   : > { %4263 = vmatmul.mubr.bf16.gmra.mxu1 %v4565_v31  ;;  %4328 = vmatprep.subr.bf16.mxu0 %v5296_v50 }
 0x236   : > { %4295 = vmatpush3.bf16.msra.mxu1 %v4570_v0  ;;  %v3665_v0 = vld [vmem:[%s5455_s4] ss:$0 sm:$0xff] }
 0x237   : > { %4296 = vmatprep.subr.bf16.mxu1 %v4572_v37 }
 0x238   : > { %4329 = vmatpush3.bf16.msra.mxu0 %v5296_v50 }
 0x23a   : > { %4297 = vmatpush3.bf16.msra.mxu1 %v4572_v37 }
 0x23b   : > { %4298 = vmatprep.subr.bf16.mxu1 %v4574_v39  ;;  %4331 = vmatmul.mubr.bf16.vlgmr.msra.gmra.mxu0 %v4584_v54 }
 0x23e   : > { %4299 = vmatpush3.bf16.msra.mxu1 %v4574_v39 }
 0x23f   : > { %4300 = vmatprep.subr.bf16.mxu1 %v4576_v41 }
 0x242   : > { %4301 = vmatpush3.bf16.msra.mxu1 %v4576_v41 }
 0x243   : > { %4302 = vmatprep.subr.bf16.mxu1 %v4578_v45 }
 0x246   : > { %4303 = vmatpush3.bf16.msra.mxu1 %v4578_v45 }
 0x247   : > { %4304 = vmatprep.subr.bf16.mxu1 %v4580_v49 }
 0x24a   : > { %4305 = vmatpush3.bf16.msra.mxu1 %v4580_v49 }
 0x24b   : > { %4338 = vmatprep.subr.bf16.mxu1 %v5265_v33 }
 0x26d   : > { %v5284_v43 = vpop.f32.mrf.mxu1 }
 0x26e   : > { %v1404_v45 = vadd.f32 %v5284_v43, %v3665_v0 }
 0x26f   : > { %v5289_v46 = vpop.f32.mrf.mxu1 }
 0x270   : > { %v1396_v41 = vadd.f32 %v3665_v0, %v5289_v46 }
 0x271   : > { %v4093_v48 = vpop.f32.mrf.mxu1 }
 0x272   : > { %v1407_v49 = vadd.f32 %v4093_v48, %v3665_v0 }
 0x273   : > { %v1398_v51 = vpop.f32.mrf.mxu1 }
 0x274   : > { %v1399_v40 = vadd.f32 %v3665_v0, %v1398_v51 }
 0x277   : > { %v5302_v53 = vpop.f32.mrf.mxu1 }
 0x278   : > { %v1420_v46 = vadd.f32 %v5302_v53, %v3665_v0 }
 0x279   : > { %v1411_v56 = vpop.f32.mrf.mxu1 }
 0x27a   : > { %v4140_v55 = vpop.f32.mrf.mxu0 }
 0x27b   : > { %v5305_v58 = vpop.f32.mrf.mxu1 }
 0x27c   : > { %v1843_v57 = vpop.f32.mrf.mxu0 }
 0x27d   : > { %v5307_v60 = vpop.f32.mrf.mxu1 }
 0x27e   : > { %v4141_v59 = vpop.f32.mrf.mxu0 }
 0x280   : > { %v5309_v61 = vpop.f32.mrf.mxu0 }
 0x283   : > { %v5311_v63 = vpop.f32.mrf.mxu0 }
 0x285   : > { %v5313_v3 = vpop.f32.mrf.mxu0 }
 0x287   : > { %v5315_v42 = vpop.f32.mrf.mxu0 }
 0x289   : > { %v5317_v6 = vpop.f32.mrf.mxu0 }
 0x28d   : > { %v4116_v62 = vpop.f32.mrf.mxu1 }
 0x28e   : > { %v1591_v50 = vadd.f32 %v4116_v62, %v1404_v45  ;;  %v1423_v62 = vadd.f32 %v5305_v58, %v3665_v0 }
 0x28f   : > { %v1558_v2 = vpop.f32.mrf.mxu1 }
 0x290   : > { %v1589_v54 = vadd.f32 %v1558_v2, %v1396_v41 }
 0x291   : > { %v4117_v4 = vpop.f32.mrf.mxu1 }
 0x292   : > { %v1592_v38 = vadd.f32 %v4117_v4, %v1407_v49  ;;  %v1874_v33 = vadd.f32 %v1843_v57, %v1589_v54  ;;  %v1415_v4 = vadd.f32 %v3665_v0, %v5307_v60 }
 0x293   : > { %v1561_v5 = vpop.f32.mrf.mxu1 }
 0x294   : > { %v1590_v35 = vadd.f32 %v1561_v5, %v1399_v40 }
 0x295   : > { %v4120_v7 = vpop.f32.mrf.mxu1 }
 0x296   : > { %v1875_v51 = vadd.f32 %v5309_v61, %v1590_v35  ;;  %v1595_v45 = vadd.f32 %v4120_v7, %v1420_v46 }
 0x297   : > { %v1574_v8 = vpop.f32.mrf.mxu1 }
 0x298   : > { %v1880_v58 = vadd.f32 %v5311_v63, %v1595_v45 }
 0x299   : > { %v4121_v10 = vpop.f32.mrf.mxu1 }
 0x29a   : > { %v1596_v57 = vadd.f32 %v4121_v10, %v1423_v62 }
 0x29b   : > { %v4188_v52 = vpop.f32.mrf.mxu0  ;;  %v1577_v14 = vpop.f32.mrf.mxu1 }
 0x29c   : > { %v1881_v35 = vadd.f32 %v5315_v42, %v1596_v57 }
 0x29d   : > { %v2183_v9 = vpop.f32.mrf.mxu0 }
 0x29f   : > { %v4189_v11 = vpop.f32.mrf.mxu0 }
 0x2a1   : > { %v5319_v15 = vpop.f32.mrf.mxu0 }
 0x2a3   : > { %v5321_v17 = vpop.f32.mrf.mxu0 }
 0x2a5   : > { %v5323_v19 = vpop.f32.mrf.mxu0 }
 0x2a7   : > { %v5325_v21 = vpop.f32.mrf.mxu0 }
 0x2a9   : > { %v5327_v23 = vpop.f32.mrf.mxu0 }
 0x2aa   : > { %5516 = vst [vmem:[#allocation25_spill] sm:$0xff] %v5327_v23 }
 0x2ad   : > { %v4164_v16 = vpop.f32.mrf.mxu1 }
 0x2af   : > { %v2013_v18 = vpop.f32.mrf.mxu1 }
 0x2b0   : > { %v2044_v23 = vadd.f32 %v2013_v18, %v1874_v33 }
 0x2b1   : > { %v4165_v20 = vpop.f32.mrf.mxu1 }
 0x2b3   : > { %v2016_v22 = vpop.f32.mrf.mxu1 }
 0x2b5   : > { %v4168_v24 = vpop.f32.mrf.mxu1 }
 0x2b6   : > { %v2050_v7 = vadd.f32 %v4168_v24, %v1880_v58 }
 0x2b7   : > { %v2029_v12 = vpop.f32.mrf.mxu1 }
 0x2b9   : > { %v4169_v27 = vpop.f32.mrf.mxu1 }
 0x2bb   : > { %v5329_v25 = vpop.f32.mrf.mxu0  ;;  %v2032_v29 = vpop.f32.mrf.mxu1 }
 0x2bd   : > { %v2635_v26 = vpop.f32.mrf.mxu0 }
 0x2bf   : > { %v5331_v28 = vpop.f32.mrf.mxu0 }
 0x2c1   : > { %v5333_v30 = vpop.f32.mrf.mxu0 }
 0x2c2   : > { %5517 = vst [vmem:[#allocation26_spill] sm:$0xff] %v5333_v30  ;;  %v1877_v30 = vadd.f32 %v4141_v59, %v1592_v38 }
 0x2c3   : > { %v5335_v1 = vpop.f32.mrf.mxu0 }
 0x2c4   : > { %5518 = vst [vmem:[#allocation27_spill] sm:$0xff] %v5335_v1  ;;  %v1876_v1 = vadd.f32 %v4140_v55, %v1591_v50  ;;  %v2047_v41 = vadd.f32 %v4165_v20, %v1877_v30  ;;  %v2045_v50 = vadd.f32 %v2016_v22, %v1875_v51  ;;  %v2214_v55 = vadd.f32 %v2183_v9, %v2044_v23 }
 0x2c5   : > { %v5337_v13 = vpop.f32.mrf.mxu0  ;;  %v2220_v30 = vadd.f32 %v5321_v17, %v2050_v7  ;;  %v5527_v7 = vld [vmem:[#allocation18_spill] sm:$0xff] }
 0x2c6   : > { %5519 = vst [vmem:[#allocation28_spill] sm:$0xff] %v5337_v13  ;;  %v2046_v43 = vadd.f32 %v4164_v16, %v1876_v1  ;;  %v2217_v5 = vadd.f32 %v4189_v11, %v2047_v41  ;;  %v2215_v61 = vadd.f32 %v5319_v15, %v2045_v50 }
 0x2c7   : > { %v5342_v37 = vpop.f32.mrf.mxu0 }
 0x2c8   : > { %5520 = vst [vmem:[#allocation29_spill] sm:$0xff] %v5342_v37  ;;  %v1412_v37 = vadd.f32 %v3665_v0, %v1411_v56  ;;  %v1594_v56 = vadd.f32 %v1577_v14, %v1415_v4  ;;  %v2216_v33 = vadd.f32 %v4188_v52, %v2046_v43  ;;  %v2051_v14 = vadd.f32 %v4169_v27, %v1881_v35 }
 0x2c9   : > { %v5346_v47 = vpop.f32.mrf.mxu0 }
 0x2ca   : > { %v1593_v2 = vadd.f32 %v1574_v8, %v1412_v37  ;;  %v1879_v9 = vadd.f32 %v5317_v6, %v1594_v56  ;;  %v2221_v1 = vadd.f32 %v5325_v21, %v2051_v14  ;;  %v5528_v14 = vld [vmem:[#allocation19_spill] sm:$0xff] }
 0x2cc   : > { %v1878_v53 = vadd.f32 %v5313_v3, %v1593_v2  ;;  %v2049_v22 = vadd.f32 %v2032_v29, %v1879_v9  ;;  %v5524_v2 = vld [vmem:[#allocation27_spill] sm:$0xff] }
 0x2cd   : > { %v4212_v32 = vpop.f32.mrf.mxu1 }
 0x2ce   : > { %v2498_v8 = vadd.f32 %v4212_v32, %v2216_v33  ;;  %v2048_v18 = vadd.f32 %v2029_v12, %v1878_v53 }
 0x2cf   : > { %v2465_v31 = vpop.f32.mrf.mxu1  ;;  %v5525_v57 = vld [vmem:[#allocation29_spill] sm:$0xff] }
 0x2d0   : > { %v2496_v59 = vadd.f32 %v2465_v31, %v2214_v55  ;;  %v2668_v11 = vadd.f32 %v5329_v25, %v2498_v8  ;;  %v2218_v23 = vadd.f32 %v5323_v19, %v2048_v18  ;;  %v5521_v31 = vld [vmem:[#allocation26_spill] sm:$0xff] }
 0x2d1   : > { %v4213_v34 = vpop.f32.mrf.mxu1 }
 0x2d2   : > { %v2499_v60 = vadd.f32 %v4213_v34, %v2217_v5  ;;  %v2666_v3 = vadd.f32 %v2635_v26, %v2496_v59  ;;  %v5522_v34 = vld [vmem:[#allocation25_spill] sm:$0xff] }
 0x2d3   : > { %v2468_v39 = vpop.f32.mrf.mxu1  ;;  %v2219_v25 = vadd.f32 %v5522_v34, %v2049_v22  ;;  %v5529_v22 = vld [vmem:[#allocation20_spill] sm:$0xff] }
 0x2d4   : > { %v2497_v20 = vadd.f32 %v2468_v39, %v2215_v61  ;;  %v2669_v42 = vadd.f32 %v5331_v28, %v2499_v60  ;;  %v5526_v60 = vld [vmem:[#allocation17_spill] sm:$0xff] }
 0x2d5   : > { %v4216_v44 = vpop.f32.mrf.mxu1 }
 0x2d6   : > { %v2667_v26 = vadd.f32 %v5521_v31, %v2497_v20  ;;  %v2502_v29 = vadd.f32 %v4216_v44, %v2220_v30 }
 0x2d7   : > { %v2481_v13 = vpop.f32.mrf.mxu1 }
 0x2d8   : > { %v2500_v6 = vadd.f32 %v2481_v13, %v2218_v23  ;;  %v5523_v13 = vld [vmem:[#allocation28_spill] sm:$0xff]  ;;  %v2672_v41 = vadd.f32 %v5524_v2, %v2502_v29  ;;  %v5532_v23 = vld [vmem:[#allocation23_spill] sm:$0xff] }
 0x2d9   : > { %v4217_v40 = vpop.f32.mrf.mxu1 }
 0x2da   : > { %v2503_v37 = vadd.f32 %v4217_v40, %v2221_v1  ;;  %v2670_v62 = vadd.f32 %v5523_v13, %v2500_v6 }
 0x2db   : > { %v5348_v36 = vpop.f32.mrf.mxu0  ;;  %v2484_v16 = vpop.f32.mrf.mxu1 }
 0x2dc   : > { %v2501_v46 = vadd.f32 %v2484_v16, %v2219_v25  ;;  %v2673_v40 = vadd.f32 %v5525_v57, %v2503_v37 }
 0x2dd   : > { %v3087_v48 = vpop.f32.mrf.mxu0 }
 0x2df   : > { %v4285_v38 = vpop.f32.mrf.mxu0 }
 0x2e1   : > { %v3090_v10 = vpop.f32.mrf.mxu0 }
 0x2e3   : > { %v4288_v15 = vpop.f32.mrf.mxu0 }
 0x2e5   : > { %v3103_v28 = vpop.f32.mrf.mxu0 }
 0x2ed   : > { %v4260_v52 = vpop.f32.mrf.mxu1 }
 0x2ee   : > { %v2838_v24 = vadd.f32 %v4260_v52, %v2668_v11  ;;  %v5530_v11 = vld [vmem:[#allocation21_spill] sm:$0xff] }
 0x2ef   : > { %v2805_v63 = vpop.f32.mrf.mxu1 }
 0x2f0   : > { %v2836_v12 = vadd.f32 %v2805_v63, %v2666_v3  ;;  %v3120_v17 = vadd.f32 %v5348_v36, %v2838_v24  ;;  %v2671_v36 = vadd.f32 %v5346_v47, %v2501_v46  ;;  %v4585_v3 = vld [vmem:[%s5016_s24 + $0x10] sm:$0xff]   ;;  %v5531_v63 = vld [vmem:[#allocation22_spill] sm:$0xff]  ;;  %v3774_v24 = vld [vmem:[%s5457_s6] ss:$0 sm:$0xff] }
 0x2f1   : > { %v4261_v32 = vpop.f32.mrf.mxu1 }
 0x2f2   : > { %v2839_v27 = vadd.f32 %v4261_v32, %v2669_v42  ;;  %v3118_v19 = vadd.f32 %v3087_v48, %v2836_v12  ;;  %v4289_v48 = vpop.f32.mrf.mxu0  ;;  %v3128_v50 = vmax.f32 %v3120_v17, 0.0  ;;  %v5533_v12 = vld [vmem:[#allocation24_spill] sm:$0xff]  ;;  %v3783_v32 = vld [vmem:[%s5459_s8] ss:$0 sm:$0xff] }
 0x2f3   : > { %v2808_v0 = vpop.f32.mrf.mxu1  ;;  %v4586_v42 = vld [vmem:[%s5016_s24 + $0x18] sm:$0xff]  }
 0x2f4   : > { %v3121_v39 = vadd.f32 %v4285_v38, %v2839_v27  ;;  %v2837_v49 = vadd.f32 %v2808_v0, %v2667_v26  ;;  %v3126_v44 = vmax.f32 %v3118_v19, 0.0  ;;  %v3106_v16 = vpop.f32.mrf.mxu0 }
 0x2f5   : > { %v4264_v54 = vpop.f32.mrf.mxu1 }
 0x2f6   : > { %v3119_v43 = vadd.f32 %v3090_v10, %v2837_v49  ;;  %v3129_v21 = vmax.f32 %v3121_v39, 0.0  ;;  %v2842_v55 = vadd.f32 %v4264_v54, %v2672_v41 }
 0x2f7   : > { %v2821_v51 = vpop.f32.mrf.mxu1 }
 0x2f8   : > { %v3127_v4 = vmax.f32 %v3119_v43, 0.0  ;;  %v2840_v45 = vadd.f32 %v2821_v51, %v2670_v62  ;;  %v3135_v53 = vpack.c.bf16 %v3129_v21, %v3128_v50  ;;  %v3124_v18 = vadd.f32 %v4288_v15, %v2842_v55 }
 0x2f9   : > { %v4265_v56 = vpop.f32.mrf.mxu1 }
 0x2fa   : > { %v2843_v33 = vadd.f32 %v4265_v56, %v2673_v40  ;;  %v3134_v38 = vpack.c.bf16 %v3127_v4, %v3126_v44  ;;  %v3122_v5 = vadd.f32 %v3103_v28, %v2840_v45  ;;  %v3132_v47 = vmax.f32 %v3124_v18, 0.0 }
 0x2fb   : > { %v2824_v59 = vpop.f32.mrf.mxu1  ;;  %v4332_v30 = vpop.f32.mrf.mxu0 }
 0x2fc   : > { %v3125_v58 = vadd.f32 %v4289_v48, %v2843_v33  ;;  %v2841_v8 = vadd.f32 %v2824_v59, %v2671_v36  ;;  %4306 = vmatprep.mubr.bf16.mxu1 %v3134_v38  ;;  %v3130_v9 = vmax.f32 %v3122_v5, 0.0  ;;  %v3388_v31 = vadd.f32 %v4332_v30, %v3783_v32 }
 0x2fd   : > { %4307 = vmatmul.mubr.bf16.vlgmr.msra.gmra.mxu1 %v3135_v53  ;;  %v3379_v15 = vpop.f32.mrf.mxu0 }
 0x2fe   : > { %v3123_v35 = vadd.f32 %v3106_v16, %v2841_v8  ;;  %4346 = vmatpush3.bf16.msra.mxu1 %v5526_v60  ;;  %v3133_v61 = vmax.f32 %v3125_v58, 0.0  ;;  %v3380_v25 = vadd.f32 %v3783_v32, %v3379_v15 }
 0x2ff   : > { %4339 = vmatprep.subr.bf16.mxu1 %v5527_v7  ;;  %v4333_v6 = vpop.f32.mrf.mxu0 }
 0x300   : > { %v3131_v10 = vmax.f32 %v3123_v35, 0.0  ;;  %v3137_v20 = vpack.c.bf16 %v3133_v61, %v3132_v47  ;;  %v3391_v0 = vadd.f32 %v4333_v6, %v3783_v32 }
 0x301   : > { %v3382_v29 = vpop.f32.mrf.mxu0 }
 0x302   : > { %4347 = vmatpush3.bf16.msra.mxu1 %v5527_v7  ;;  %v3136_v52 = vpack.c.bf16 %v3131_v10, %v3130_v9  ;;  %v3383_v49 = vadd.f32 %v3783_v32, %v3382_v29 }
 0x303   : > { %4340 = vmatprep.subr.bf16.mxu1 %v5528_v14 }
 0x304   : > { %4310 = vmatprep.mubr.bf16.mxu1 %v3136_v52 }
 0x305   : > { %4311 = vmatmul.mubr.bf16.gmra.mxu1 %v3137_v20 }
 0x306   : > { %4348 = vmatpush3.bf16.msra.mxu1 %v5528_v14  ;;  %4334 = vmatprep.mubr.bf16.mxu1 %v4585_v3 }
 0x307   : > { %4341 = vmatprep.subr.bf16.mxu1 %v5529_v22 }
 0x30a   : > { %4349 = vmatpush3.bf16.msra.mxu1 %v5529_v22 }
 0x30b   : > { %4342 = vmatprep.subr.bf16.mxu1 %v5530_v11 }
 0x30e   : > { %4350 = vmatpush3.bf16.msra.mxu1 %v5530_v11 }
 0x30f   : > { %4343 = vmatprep.subr.bf16.mxu1 %v5531_v63 }
 0x312   : > { %4351 = vmatpush3.bf16.msra.mxu1 %v5531_v63 }
 0x313   : > { %4344 = vmatprep.subr.bf16.mxu1 %v5532_v23 }
 0x316   : > { %4352 = vmatpush3.bf16.msra.mxu1 %v5532_v23 }
 0x317   : > { %4345 = vmatprep.subr.bf16.mxu1 %v5533_v12 }
 0x31a   : > { %4353 = vmatpush3.bf16.msra.mxu1 %v5533_v12 }
 0x31d   : > { %4335 = vmatmul.mubr.bf16.vlgmr.msra.gmra.mxu1 %v4586_v42 }
 0x3bd   : > { %v4308_v1 = vpop.f32.mrf.mxu1 }
 0x3be   : > { %v3252_v27 = vadd.f32 %v4308_v1, %v3774_v24 }
 0x3bf   : > { %v3243_v26 = vpop.f32.mrf.mxu1 }
 0x3c0   : > { %v3244_v34 = vadd.f32 %v3774_v24, %v3243_v26  ;;  %v3412_v19 = vadd.f32 %v3388_v31, %v3252_v27 }
 0x3c1   : > { %v4309_v37 = vpop.f32.mrf.mxu1 }
 0x3c2   : > { %v3255_v39 = vadd.f32 %v4309_v37, %v3774_v24  ;;  %v3410_v17 = vadd.f32 %v3380_v25, %v3244_v34  ;;  %v3420_v43 = vmax.f32 %v3412_v19, 0.0 }
 0x3c3   : > { %v3246_v28 = vpop.f32.mrf.mxu1 }
 0x3c4   : > { %v3413_v54 = vadd.f32 %v3391_v0, %v3255_v39  ;;  %v3247_v46 = vadd.f32 %v3774_v24, %v3246_v28  ;;  %v3418_v21 = vmax.f32 %v3410_v17, 0.0 }
 0x3c5   : > { %v4312_v44 = vpop.f32.mrf.mxu1 }
 0x3c6   : > { %v3421_v13 = vmax.f32 %v3413_v54, 0.0  ;;  %v3411_v62 = vadd.f32 %v3383_v49, %v3247_v46  ;;  %v3268_v55 = vadd.f32 %v4312_v44, %v3774_v24 }
 0x3c7   : > { %v3259_v4 = vpop.f32.mrf.mxu1 }
 0x3c8   : > { %v3855_v2 = vpack.c.bf16 %v3421_v13, %v3420_v43  ;;  %v3419_v41 = vmax.f32 %v3411_v62, 0.0  ;;  %v3260_v36 = vadd.f32 %v3774_v24, %v3259_v4 }
 0x3c9   : > { %v4313_v45 = vpop.f32.mrf.mxu1 }
 0x3ca   : > { %3867 = vst [vmem:[%s5395_s1 + $0x8] sm:$0xff] %v3855_v2   ;;  %v3850_v51 = vpack.c.bf16 %v3419_v41, %v3418_v21  ;;  %v3271_v38 = vadd.f32 %v4313_v45, %v3774_v24 }
 0x3cb   : > { %v3262_v57 = vpop.f32.mrf.mxu1 }
 0x3cc   : > { %3851 = vst [vmem:[%s5395_s1] sm:$0xff] %v3850_v51   ;;  %v3263_v58 = vadd.f32 %v3774_v24, %v3262_v57 }
 0x3dd   : > { %v4336_v40 = vpop.f32.mrf.mxu1 }
 0x3de   : > { %v3404_v48 = vadd.f32 %v4336_v40, %v3783_v32 }
 0x3df   : > { %v3395_v50 = vpop.f32.mrf.mxu1 }
 0x3e0   : > { %v3396_v56 = vadd.f32 %v3783_v32, %v3395_v50  ;;  %v3416_v53 = vadd.f32 %v3404_v48, %v3268_v55 }
 0x3e1   : > { %v4337_v33 = vpop.f32.mrf.mxu1 }
 0x3e2   : > { %v3407_v59 = vadd.f32 %v4337_v33, %v3783_v32  ;;  %v3414_v8 = vadd.f32 %v3396_v56, %v3260_v36  ;;  %v3424_v35 = vmax.f32 %v3416_v53, 0.0 }
 0x3e3   : > { %v3398_v5 = vpop.f32.mrf.mxu1 }
 0x3e4   : > { %v3417_v16 = vadd.f32 %v3407_v59, %v3271_v38  ;;  %v3399_v18 = vadd.f32 %v3783_v32, %v3398_v5  ;;  %v3422_v7 = vmax.f32 %v3414_v8, 0.0 }
 0x3e6   : > { %v3425_v60 = vmax.f32 %v3417_v16, 0.0  ;;  %v3415_v61 = vadd.f32 %v3399_v18, %v3263_v58 }
 0x3e8   : > { %v3865_v9 = vpack.c.bf16 %v3425_v60, %v3424_v35  ;;  %v3423_v10 = vmax.f32 %v3415_v61, 0.0 }
 0x3ea   : > { %3869 = vst [vmem:[%s5395_s1 + $0x18] sm:$0xff] %v3865_v9   ;;  %v3860_v47 = vpack.c.bf16 %v3423_v10, %v3422_v7 }
 0x3ec   : > { %3868 = vst [vmem:[%s5395_s1 + $0x10] sm:$0xff] %v3860_v47  }
 0x3ed   : > { %4732 = shalt.err (!%p4729_p5)
}
 0x3ee   : > { %s4733_s20 = scalar_lea.hbm %s5406_s15, 512  ;;  %s4737_s28 = scalar_lea.hbm %s5460_s9, 1024 }
 0x3ef   : > { %p4734_p6 = scmp.ne.s32.totalorder %s5406_s15, %s4733_s20  ;;  %p4738_p9 = scmp.lt.s32.totalorder %s5406_s15, %s5460_s9 }
 0x3f0   : > { %p4739_p2 = scmp.lt.s32.totalorder %s4737_s28, %s4733_s20 }
 0x3f1   : > { %p4735_p4 = pnand %p4734_p6, %p5534_p12 }
 0x3f2   : > { %p4740_p3 = por %p4739_p2, %p4738_p9 }
 0x3f3   : > { %p4736_p8 = pneg %p4735_p4 }
 0x3f5   : > { %p4741_p10 = pnand %p4740_p3, %p4736_p8 }
 0x3f7   : > { %4744 = shalt.err (!%p4741_p10)
}
 0x3f8   : > { %s4802_s22 = smov 64   ;;  %s4803_s24 = smov 4  }
 0x3f9   : > { %4372 = dma.vmem_to_hbm [thread:$0]  (%p5534_p12), %s5401_s29, 512, %s5406_s15, %s3467_s17, %s4802_s22, %s4802_s22, %s4803_s24  }
 0x3fa PF: > { %s3495_s26 = sand.u32 1, %s4779_s30   ;;  %p5535_p7 = scmp.ne.s32.totalorder %s5486_s16, 0 }
 0x3fb   : > { %p5536_p1 = scmp.ge.s32.totalorder %s4791_s12, 2  ;;  %s3496_s13 = scalar_lea.sflag [#allocation5], %s3495_s26 }
 0x3fd   : > { %p4392_p13 = pnand %p5536_p1, %p5535_p7 }
 0x3ff   : > { %p4393_p0 = pneg %p4392_p13 }
 0x401   : > { %4774 = dma.done.wait (%p4393_p0), %s3496_s13, 512  }
 0x402   : > { %4776 = vsyncadd (%p4393_p0), %s3496_s13, 4294966784  ;;  %p24_p11 = scmp.ge.s32.totalorder %s4954_s18, 4   ;;  %s5537_s30 = smov %s4783_s10 }
 0x403   : > { %s5538_s10 = smov %s4787_s11  ;;  %s5539_s11 = smov %s4970_s23 }
 0x404   : > { %s5540_s12 = smov %s4954_s18  ;;  %26 = sbr.rel (!%p24_p11) target bundleno = 11 (0xb), region = 130 }
 0x409   :  { %3501 = vsyncpa [#allocation4], 1 }
 0x40a   :  { %3503 = vsyncpa [#allocation4 + $0x1], 1 }
 0x40b   :  { %3504 = vsyncpa [#allocation7], 1 }
 0x40c   :  { %3505 = vsyncpa [#allocation10], 1 }
 0x40d   :  { %3506 = vsyncpa [#allocation5], 1 }
 0x40e   :  { %3508 = vsyncpa [#allocation5 + $0x1], 1 }

</bundles_post_ra>
